<compile_context>
chip_gen: v5e
topology: v5e:2x2
jax: 0.10.0
libtpu: 0.0.40
codegen_flags: <defaults>
</compile_context>

<pallas_src>
import numpy as np
import jax
import jax.numpy as jnp
from jax.experimental import pallas as pl
from jax.experimental.pallas import tpu as pltpu

LATENT_DIM = 32
HIDDEN = 512
INPUT_SHAPE = (2, 8, 8)          # (C, H, W) -> prod = 128 (lane-dense output)
OUT_DIM = int(np.prod(INPUT_SHAPE))
BN_EPS = 1e-5


def _bn_relu(h, gamma, beta):
    """Training-mode BatchNorm1d (batch stats, biased var) + ReLU, fused into
    one scale/shift FMA. h is f32; stats computed in f32."""
    inv_b = 1.0 / h.shape[0]
    mean = jnp.sum(h, axis=0, keepdims=True) * inv_b
    ex2 = jnp.sum(h * h, axis=0, keepdims=True) * inv_b
    var = jnp.maximum(ex2 - mean * mean, 0.0)
    scale = gamma * jax.lax.rsqrt(var + BN_EPS)      # EUP rsqrt
    shift = beta - mean * scale
    return jnp.maximum(h * scale + shift, 0.0)


def generator_kernel(noise_ref, w1_ref, w2_ref, w3_ref, bn_ref, b3_ref, out_ref):
    # bn_ref: (4, HIDDEN) f32 = [g1; be1; g2; be2]  (static-row slices = free views)
    x = noise_ref[...].astype(jnp.bfloat16)                                 # (B, latent)

    # ---- Linear 1 (bias cancelled by training-mode BN) + BN + ReLU ----
    h = jnp.dot(x, w1_ref[...], preferred_element_type=jnp.float32)        # (B, 512) f32
    h = _bn_relu(h, bn_ref[0:1, :], bn_ref[1:2, :])

    # ---- Linear 2 (bias cancelled by training-mode BN) + BN + ReLU ----
    h = jnp.dot(h.astype(jnp.bfloat16), w2_ref[...],
                preferred_element_type=jnp.float32)                        # (B, 512) f32
    h = _bn_relu(h, bn_ref[2:3, :], bn_ref[3:4, :])

    # ---- Linear 3 (output head, bias kept) ----
    out = jnp.dot(h.astype(jnp.bfloat16), w3_ref[...],
                  preferred_element_type=jnp.float32) + b3_ref[...]        # (B, 128) f32
    out_ref[...] = out.astype(out_ref.dtype)


def generator_forward(noise, params, out_dtype=jnp.float32):
    """noise: (B, LATENT_DIM) f32.
    params: dict from init_params; bf16 weight copies and the packed BN array
    are prepared once at init (no per-call casts -> no extra HBM traffic).
    out_dtype: set to jnp.bfloat16 if the downstream consumer accepts it to
    halve the output writeback at large batch sizes."""
    B = noise.shape[0]
    kernel_args = (noise,
                   params["w1_bf16"], params["w2_bf16"], params["w3_bf16"],
                   params["bn_pack"], params["b3"])

    flops = 2 * B * (LATENT_DIM * HIDDEN + HIDDEN * HIDDEN + HIDDEN * OUT_DIM)
    bytes_accessed = (sum(int(a.size) * a.dtype.itemsize for a in kernel_args)
                      + B * OUT_DIM * jnp.dtype(out_dtype).itemsize)
    cost = pl.CostEstimate(flops=flops,
                           transcendentals=2 * HIDDEN,          # rsqrt per BN feature
                           bytes_accessed=bytes_accessed)

    flat_out = pl.pallas_call(
        generator_kernel,
        out_shape=jax.ShapeDtypeStruct((B, OUT_DIM), out_dtype),
        in_specs=[pl.BlockSpec(memory_space=pltpu.MemorySpace.VMEM)] * len(kernel_args),
        out_specs=pl.BlockSpec(memory_space=pltpu.MemorySpace.VMEM),
        cost_estimate=cost,
        compiler_params=pltpu.CompilerParams(vmem_limit_bytes=4 * 1024 * 1024),
    )(*kernel_args)
    # Glue: view(B, *input_shape) -> NCHW
    return flat_out.reshape(B, *INPUT_SHAPE)


def init_params(key):
    """PyTorch-default Linear init (uniform(-1/sqrt(fan_in), 1/sqrt(fan_in)))
    and BatchNorm1d defaults (gamma=1, beta=0).
    f32 masters kept; bf16 weight copies + packed BN vector built ONCE here so
    the forward path does no per-call casts."""
    ks = jax.random.split(key, 6)

    def linear(kw, kb, fan_in, fan_out):
        bound = 1.0 / np.sqrt(fan_in)
        w = jax.random.uniform(kw, (fan_in, fan_out), jnp.float32, -bound, bound)
        b = jax.random.uniform(kb, (1, fan_out), jnp.float32, -bound, bound)
        return w, b

    w1, b1 = linear(ks[0], ks[1], LATENT_DIM, HIDDEN)
    w2, b2 = linear(ks[2], ks[3], HIDDEN, HIDDEN)
    w3, b3 = linear(ks[4], ks[5], HIDDEN, OUT_DIM)

    g1 = jnp.ones((1, HIDDEN), jnp.float32)
    be1 = jnp.zeros((1, HIDDEN), jnp.float32)
    g2 = jnp.ones((1, HIDDEN), jnp.float32)
    be2 = jnp.zeros((1, HIDDEN), jnp.float32)

    return dict(
        # f32 master copies (what an optimizer would update)
        w1=w1, b1=b1, g1=g1, be1=be1,
        w2=w2, b2=b2, g2=g2, be2=be2,
        w3=w3, b3=b3,
        # kernel-ready, hoisted out of the forward path
        w1_bf16=w1.astype(jnp.bfloat16),
        w2_bf16=w2.astype(jnp.bfloat16),
        w3_bf16=w3.astype(jnp.bfloat16),
        bn_pack=jnp.concatenate([g1, be1, g2, be2], axis=0),   # (4, HIDDEN) f32
    )


def _bn_relu_ref(h, g, be):
    m = jnp.mean(h, axis=0, keepdims=True)
    v = jnp.mean((h - m) ** 2, axis=0, keepdims=True)
    return jnp.maximum((h - m) / jnp.sqrt(v + BN_EPS) * g + be, 0.0)


def reference_forward_bf16(noise, p):
    """Reference with the SAME bf16 weight quantization as the kernel but the
    literal PyTorch formulas (biases included, two-pass variance)."""
    w1 = p["w1"].astype(jnp.bfloat16)
    w2 = p["w2"].astype(jnp.bfloat16)
    w3 = p["w3"].astype(jnp.bfloat16)
    h = jnp.dot(noise.astype(jnp.bfloat16), w1, preferred_element_type=jnp.float32) + p["b1"]
    h = _bn_relu_ref(h, p["g1"], p["be1"])
    h = jnp.dot(h.astype(jnp.bfloat16), w2, preferred_element_type=jnp.float32) + p["b2"]
    h = _bn_relu_ref(h, p["g2"], p["be2"])
    out = jnp.dot(h.astype(jnp.bfloat16), w3, preferred_element_type=jnp.float32) + p["b3"]
    return out.reshape(noise.shape[0], *INPUT_SHAPE)


def reference_forward_f32(noise, p):
    """Full-precision PyTorch-semantics reference (loose check of bf16 quant error)."""
    h = _bn_relu_ref(noise @ p["w1"] + p["b1"], p["g1"], p["be1"])
    h = _bn_relu_ref(h @ p["w2"] + p["b2"], p["g2"], p["be2"])
    out = h @ p["w3"] + p["b3"]
    return out.reshape(noise.shape[0], *INPUT_SHAPE)


if __name__ == "__main__":
    key = jax.random.PRNGKey(0)
    k_noise, k_params = jax.random.split(key)

    B = 8   # BN with batch stats requires B > 1 (same constraint as PyTorch training mode)
    noise = jax.random.normal(k_noise, (B, LATENT_DIM), jnp.float32)
    params = init_params(k_params)

    out = jax.block_until_ready(generator_forward(noise, params))
    assert out.shape == (B,) + INPUT_SHAPE, out.shape

    # Tight check against a bf16-matched reference (validates kernel math,
    # bias cancellation, packed-BN slicing and fused-BN rewrite).
    ref_bf16 = reference_forward_bf16(noise, params)
    np.testing.assert_allclose(np.asarray(out), np.asarray(ref_bf16), rtol=1e-4, atol=1e-4)

    # Loose check against the exact f32 PyTorch semantics (bounds bf16 quant error).
    ref_f32 = reference_forward_f32(noise, params)
    np.testing.assert_allclose(np.asarray(out), np.asarray(ref_f32), rtol=5e-2, atol=5e-2)

    print("KERNEL_OK")
</pallas_src>

<mosaic_0001>
module attributes {stable_mosaic.version = 11 : i64} {
  func.func @generator_kernel(%arg0: memref<8x32xf32, #tpu.memory_space<vmem>>, %arg1: memref<32x512xbf16, #tpu.memory_space<vmem>>, %arg2: memref<512x512xbf16, #tpu.memory_space<vmem>>, %arg3: memref<512x128xbf16, #tpu.memory_space<vmem>>, %arg4: memref<4x512xf32, #tpu.memory_space<vmem>>, %arg5: memref<1x128xf32, #tpu.memory_space<vmem>>, %arg6: memref<8x128xf32, #tpu.memory_space<vmem>>) attributes {dimension_semantics = [], scalar_prefetch = 0 : i64, scratch_operands = 0 : i64, tpu.core_type = #tpu.core_type<tc>} {
    %c0 = arith.constant 0 : index
    %c0_0 = arith.constant 0 : index
    %0 = vector.load %arg0[%c0, %c0_0] : memref<8x32xf32, #tpu.memory_space<vmem>>, vector<8x32xf32>
    %1 = arith.truncf %0 : vector<8x32xf32> to vector<8x32xbf16>
    %c0_1 = arith.constant 0 : index
    %c0_2 = arith.constant 0 : index
    %2 = vector.load %arg1[%c0_1, %c0_2] : memref<32x512xbf16, #tpu.memory_space<vmem>>, vector<32x512xbf16>
    %cst = arith.constant dense<0.000000e+00> : vector<8x512xf32>
    %3 = tpu.matmul %1, %2, %cst {dimension_numbers = #tpu.dot_dimension_numbers<[1], [0], [0], [1], [0, 0, 1, 1], [], []>} : vector<8x32xbf16>, vector<32x512xbf16>, vector<8x512xf32> -> vector<8x512xf32>
    %c0_3 = arith.constant 0 : index
    %c0_4 = arith.constant 0 : index
    %4 = vector.load %arg4[%c0_3, %c0_4] : memref<4x512xf32, #tpu.memory_space<vmem>>, vector<1x512xf32>
    %c1 = arith.constant 1 : index
    %c0_5 = arith.constant 0 : index
    %5 = vector.load %arg4[%c1, %c0_5] : memref<4x512xf32, #tpu.memory_space<vmem>>, vector<1x512xf32>
    %cst_6 = arith.constant dense<0.000000e+00> : vector<512xf32>
    %6 = vector.multi_reduction <add>, %3, %cst_6 [0] : vector<8x512xf32> to vector<512xf32>
    %7 = vector.shape_cast %6 : vector<512xf32> to vector<1x512xf32>
    %cst_7 = arith.constant 1.250000e-01 : f32
    %8 = vector.broadcast %cst_7 : f32 to vector<1x512xf32>
    %9 = arith.mulf %7, %8 : vector<1x512xf32>
    %10 = arith.mulf %3, %3 : vector<8x512xf32>
    %cst_8 = arith.constant dense<0.000000e+00> : vector<512xf32>
    %11 = vector.multi_reduction <add>, %10, %cst_8 [0] : vector<8x512xf32> to vector<512xf32>
    %12 = vector.shape_cast %11 : vector<512xf32> to vector<1x512xf32>
    %cst_9 = arith.constant 1.250000e-01 : f32
    %13 = vector.broadcast %cst_9 : f32 to vector<1x512xf32>
    %14 = arith.mulf %12, %13 : vector<1x512xf32>
    %15 = arith.mulf %9, %9 : vector<1x512xf32>
    %16 = arith.subf %14, %15 : vector<1x512xf32>
    %cst_10 = arith.constant 0.000000e+00 : f32
    %17 = vector.broadcast %cst_10 : f32 to vector<1x512xf32>
    %18 = arith.maximumf %16, %17 : vector<1x512xf32>
    %cst_11 = arith.constant 9.99999974E-6 : f32
    %19 = vector.broadcast %cst_11 : f32 to vector<1x512xf32>
    %20 = arith.addf %18, %19 : vector<1x512xf32>
    %21 = math.rsqrt %20 : vector<1x512xf32>
    %22 = arith.mulf %4, %21 : vector<1x512xf32>
    %23 = arith.mulf %9, %22 : vector<1x512xf32>
    %24 = arith.subf %5, %23 : vector<1x512xf32>
    %25 = vector.broadcast %22 : vector<1x512xf32> to vector<8x512xf32>
    %26 = arith.mulf %3, %25 : vector<8x512xf32>
    %27 = vector.broadcast %24 : vector<1x512xf32> to vector<8x512xf32>
    %28 = arith.addf %26, %27 : vector<8x512xf32>
    %cst_12 = arith.constant 0.000000e+00 : f32
    %29 = vector.broadcast %cst_12 : f32 to vector<8x512xf32>
    %30 = arith.maximumf %28, %29 : vector<8x512xf32>
    %31 = arith.truncf %30 : vector<8x512xf32> to vector<8x512xbf16>
    %c0_13 = arith.constant 0 : index
    %c0_14 = arith.constant 0 : index
    %32 = vector.load %arg2[%c0_13, %c0_14] : memref<512x512xbf16, #tpu.memory_space<vmem>>, vector<512x512xbf16>
    %cst_15 = arith.constant dense<0.000000e+00> : vector<8x512xf32>
    %33 = tpu.matmul %31, %32, %cst_15 {dimension_numbers = #tpu.dot_dimension_numbers<[1], [0], [0], [1], [0, 0, 1, 1], [], []>} : vector<8x512xbf16>, vector<512x512xbf16>, vector<8x512xf32> -> vector<8x512xf32>
    %c2 = arith.constant 2 : index
    %c0_16 = arith.constant 0 : index
    %34 = vector.load %arg4[%c2, %c0_16] : memref<4x512xf32, #tpu.memory_space<vmem>>, vector<1x512xf32>
    %c3 = arith.constant 3 : index
    %c0_17 = arith.constant 0 : index
    %35 = vector.load %arg4[%c3, %c0_17] : memref<4x512xf32, #tpu.memory_space<vmem>>, vector<1x512xf32>
    %cst_18 = arith.constant dense<0.000000e+00> : vector<512xf32>
    %36 = vector.multi_reduction <add>, %33, %cst_18 [0] : vector<8x512xf32> to vector<512xf32>
    %37 = vector.shape_cast %36 : vector<512xf32> to vector<1x512xf32>
    %cst_19 = arith.constant 1.250000e-01 : f32
    %38 = vector.broadcast %cst_19 : f32 to vector<1x512xf32>
    %39 = arith.mulf %37, %38 : vector<1x512xf32>
    %40 = arith.mulf %33, %33 : vector<8x512xf32>
    %cst_20 = arith.constant dense<0.000000e+00> : vector<512xf32>
    %41 = vector.multi_reduction <add>, %40, %cst_20 [0] : vector<8x512xf32> to vector<512xf32>
    %42 = vector.shape_cast %41 : vector<512xf32> to vector<1x512xf32>
    %cst_21 = arith.constant 1.250000e-01 : f32
    %43 = vector.broadcast %cst_21 : f32 to vector<1x512xf32>
    %44 = arith.mulf %42, %43 : vector<1x512xf32>
    %45 = arith.mulf %39, %39 : vector<1x512xf32>
    %46 = arith.subf %44, %45 : vector<1x512xf32>
    %cst_22 = arith.constant 0.000000e+00 : f32
    %47 = vector.broadcast %cst_22 : f32 to vector<1x512xf32>
    %48 = arith.maximumf %46, %47 : vector<1x512xf32>
    %cst_23 = arith.constant 9.99999974E-6 : f32
    %49 = vector.broadcast %cst_23 : f32 to vector<1x512xf32>
    %50 = arith.addf %48, %49 : vector<1x512xf32>
    %51 = math.rsqrt %50 : vector<1x512xf32>
    %52 = arith.mulf %34, %51 : vector<1x512xf32>
    %53 = arith.mulf %39, %52 : vector<1x512xf32>
    %54 = arith.subf %35, %53 : vector<1x512xf32>
    %55 = vector.broadcast %52 : vector<1x512xf32> to vector<8x512xf32>
    %56 = arith.mulf %33, %55 : vector<8x512xf32>
    %57 = vector.broadcast %54 : vector<1x512xf32> to vector<8x512xf32>
    %58 = arith.addf %56, %57 : vector<8x512xf32>
    %cst_24 = arith.constant 0.000000e+00 : f32
    %59 = vector.broadcast %cst_24 : f32 to vector<8x512xf32>
    %60 = arith.maximumf %58, %59 : vector<8x512xf32>
    %61 = arith.truncf %60 : vector<8x512xf32> to vector<8x512xbf16>
    %c0_25 = arith.constant 0 : index
    %c0_26 = arith.constant 0 : index
    %62 = vector.load %arg3[%c0_25, %c0_26] : memref<512x128xbf16, #tpu.memory_space<vmem>>, vector<512x128xbf16>
    %cst_27 = arith.constant dense<0.000000e+00> : vector<8x128xf32>
    %63 = tpu.matmul %61, %62, %cst_27 {dimension_numbers = #tpu.dot_dimension_numbers<[1], [0], [0], [1], [0, 0, 1, 1], [], []>} : vector<8x512xbf16>, vector<512x128xbf16>, vector<8x128xf32> -> vector<8x128xf32>
    %c0_28 = arith.constant 0 : index
    %c0_29 = arith.constant 0 : index
    %64 = vector.load %arg5[%c0_28, %c0_29] : memref<1x128xf32, #tpu.memory_space<vmem>>, vector<1x128xf32>
    %65 = vector.broadcast %64 : vector<1x128xf32> to vector<8x128xf32>
    %66 = arith.addf %63, %65 : vector<8x128xf32>
    %c0_30 = arith.constant 0 : index
    %c0_31 = arith.constant 0 : index
    %67 = vector.load %arg6[%c0_30, %c0_31] : memref<8x128xf32, #tpu.memory_space<vmem>>, vector<8x128xf32>
    tpu.vector_store %arg6[%c0_30, %c0_31], %66 {strides = array<i32>} : memref<8x128xf32, #tpu.memory_space<vmem>>, vector<8x128xf32>,
    return
  }
}

</mosaic_0001>

<bundles_post_ra>
// kernel: tpu_custom_call.1
= control target key start
LH: loop header
LB: loop body
LE: loop exit
PB: predicated region body
PF: predicated region fallthrough
CT: control target
= control target key end

     0   :  { %11 = vsyncpa [#allocation3], 0  ;;  %s3204_s0 = inlined_call_operand.hbm [shape: f32[8,32], index: 0, kind: input, shape index: {}]   ;;  %s3205_s1 = inlined_call_operand.hbm [shape: bf16[32,512], index: 1, kind: input, shape index: {}]   ;;  %s3206_s2 = inlined_call_operand.hbm [shape: bf16[512,512], index: 2, kind: input, shape index: {}]   ;;  %s3207_s3 = inlined_call_operand.hbm [shape: bf16[512,128], index: 3, kind: input, shape index: {}]   ;;  %s3208_s4 = inlined_call_operand.hbm [shape: f32[4,512], index: 4, kind: input, shape index: {}]   ;;  %s3209_s5 = inlined_call_operand.vmem [shape: f32[1,128], index: 5, kind: input, shape index: {}]   ;;  %s3210_s6 = inlined_call_operand.hbm [shape: f32[8,128], index: 6, kind: output, shape index: {}]  }
   0x1   :  { %12 = vsyncpa [#allocation6], 0 }
   0x2   :  { %13 = vsyncpa [#allocation9], 0  ;;  %s30_s23 = sshll.u32 %s3205_s1, 4  ;;  %s31_s23 = int_to_ptr.hbm [resolvable:$true] %s30_s23 }
   0x3   :  { %14 = vsyncpa [#allocation4], 0  ;;  %s2902_s24 = smov [#allocation5]   ;;  %s56_s28 = sshll.u32 %s3207_s3, 4  ;;  %s57_s28 = int_to_ptr.hbm [resolvable:$true] %s56_s28 }
   0x4   :  { %s32_s25 = sshll.u32 %s2902_s24, 4  ;;  %s2903_s29 = smov 256   ;;  %s33_s25 = int_to_ptr.vmem [resolvable:$true] %s32_s25 }
   0x5   :  { %s2904_s30 = smov 16   ;;  %s2905_s7 = smov [#allocation8]  }
   0x6   :  { %38 = dma.hbm_to_vmem [thread:$0]  %s31_s23, 1024, %s33_s25, [#allocation6], %s2903_s29, %s2903_s29, %s2904_s30  }
   0x7   :  { %s58_s8 = sshll.u32 %s2905_s7, 4  ;;  %s2906_s9 = smov 64   ;;  %s59_s8 = int_to_ptr.vmem [resolvable:$true] %s58_s8 }
   0x8   :  { %s2907_s10 = smov 4   ;;  %s20_s12 = sshll.u32 %s3204_s0, 4  ;;  %s21_s12 = int_to_ptr.hbm [resolvable:$true] %s20_s12 }
   0x9   :  { %64 = dma.hbm_to_vmem [thread:$0]  %s57_s28, 4096, %s59_s8, [#allocation9], %s2906_s9, %s2906_s9, %s2907_s10  }
   0xa   :  { %s2908_s13 = smov [#allocation2]   ;;  %s43_s16 = sshll.u32 %s3206_s2, 4  ;;  %s44_s16 = int_to_ptr.hbm [resolvable:$true] %s43_s16 }
   0xb   :  { %s22_s14 = sshll.u32 %s2908_s13, 4  ;;  %s2909_s17 = smov [#allocation7]   ;;  %s23_s14 = int_to_ptr.vmem [resolvable:$true] %s22_s14 }
   0xc   :  { %25 = dma.hbm_to_vmem [thread:$0]  %s21_s12, 128, %s23_s14, [#allocation3]  }
   0xd   :  { %s45_s18 = sshll.u32 %s2909_s17, 4  ;;  %s70_s21 = sshll.u32 %s3208_s4, 4  ;;  %s46_s18 = int_to_ptr.vmem [resolvable:$true] %s45_s18  ;;  %s71_s21 = int_to_ptr.hbm [resolvable:$true] %s70_s21 }
   0xe   :  { %51 = dma.hbm_to_vmem [thread:$0]  %s44_s16, 16384, %s46_s18, [#allocation6], %s2903_s29, %s2903_s29, %s2904_s30  }
   0xf   :  { %s2910_s0 = smov [#allocation10]  }
  0x10   :  { %s72_s22 = sshll.u32 %s2910_s0, 4  ;;  %s73_s22 = int_to_ptr.vmem [resolvable:$true] %s72_s22 }
  0x11   :  { %75 = dma.hbm_to_vmem [thread:$0]  %s71_s21, 256, %s73_s22, [#allocation9]  }
  0x12   :  { %2894 = dma.done.wait [#allocation3], 128  }
  0x13   :  { %2895 = vsyncadd [#allocation3], 4294967168 }
  0x14   :  { %2896 = dma.done.wait [#allocation6], 17408  }
  0x15   :  { %2897 = vsyncadd [#allocation6], 4294949888 }
  0x16   :  { %2898 = dma.done.wait [#allocation9], 4352  }
  0x17   :  { %2899 = vsyncadd [#allocation9], 4294962944  ;;  %v1897_v0 = vld [vmem:[#allocation5 + $0x20] sm:$0xf]  ;;  %v2561_v1 = vld [vmem:[#allocation5 + $0x2c] sm:$0xf0] }
  0x18   :  { %v2559_v2 = vld [vmem:[#allocation5 + $0x24] sm:$0xf]  ;;  %v1898_v3 = vor.u32 %v2561_v1, %v1897_v0  ;;  %v1899_v4 = vld [vmem:[#allocation5 + $0x30] sm:$0xf0]  ;;  %v1905_v5 = vld [vmem:[#allocation5 + $0x28] sm:$0xf] }
  0x19   :  { %v2562_v6 = vld [vmem:[#allocation5 + $0x34] sm:$0xf0]  ;;  %v1902_v7 = vor.u32 %v2559_v2, %v1899_v4  ;;  %v2560_v9 = vld [vmem:[#allocation5 + $0x2c] sm:$0xf]  ;;  %v1907_v10 = vld [vmem:[#allocation5 + $0x38] sm:$0xf0] }
  0x1a   :  { %v1906_v8 = vor.u32 %v2562_v6, %v1905_v5  ;;  %v1881_v11 = vld [vmem:[#allocation5] sm:$0xf]  ;;  %159 = vmatpush.bf16.msra.mxu0 %v1898_v3  ;;  %v1910_v12 = vor.u32 %v2560_v9, %v1907_v10  ;;  %v2557_v13 = vld [vmem:[#allocation5 + $0xc] sm:$0xf0]  ;;  %v2555_v14 = vld [vmem:[#allocation5 + $0x4] sm:$0xf] }
  0x1b   :  { %v1883_v15 = vld [vmem:[#allocation5 + $0x10] sm:$0xf0]  ;;  %172 = vmatpush.bf16.msra.mxu1 %v1902_v7  ;;  %v1882_v16 = vor.u32 %v2557_v13, %v1881_v11  ;;  %v1889_v18 = vld [vmem:[#allocation5 + $0x8] sm:$0xf]  ;;  %v2558_v19 = vld [vmem:[#allocation5 + $0x14] sm:$0xf0] }
  0x1c   :  { %185 = vmatpush.bf16.msra.mxu2 %v1906_v8  ;;  %v1886_v17 = vor.u32 %v2555_v14, %v1883_v15  ;;  %v2556_v20 = vld [vmem:[#allocation5 + $0xc] sm:$0xf]  ;;  %198 = vmatpush.bf16.msra.mxu3 %v1910_v12  ;;  %v1890_v21 = vor.u32 %v2558_v19, %v1889_v18  ;;  %v1891_v22 = vld [vmem:[#allocation5 + $0x18] sm:$0xf0]  ;;  %vm149_vm0 = vcmask 261120   ;;  %vm331_vm6 = vcmask 1040384  }
  0x1d   :  { %v99_v23 = vld [vmem:[#allocation2] sm:$0xff]  ;;  %v1894_v24 = vor.u32 %v2556_v20, %v1891_v22  ;;  %v2029_v26 = vld [vmem:[#allocation7 + $0xe0] sm:$0xf]  ;;  %v2593_v27 = vld [vmem:[#allocation7 + $0xec] sm:$0xf0]  ;;  %vm333_vm13 = vcmask 1042434  }
  0x1e   :  { %v100_v25 = vpack.c.bf16 %v99_v23, %v99_v23  ;;  %160 = vmatpush.bf16.msra.mxu0 %v1882_v16  ;;  %v2157_v28 = vld [vmem:[#allocation7 + $0x1e0] sm:$0xf]  ;;  %v2030_v29 = vor.u32 %v2593_v27, %v2029_v26  ;;  %v2625_v30 = vld [vmem:[#allocation7 + $0x1ec] sm:$0xf0]  ;;  %vm335_vm15 = vcmask 1041408   ;;  %s2911_s23 = smov [#allocation11]  }
  0x1f   :  { %173 = vmatpush.bf16.msra.mxu1 %v1886_v17  ;;  %v2285_v31 = vld [vmem:[#allocation7 + $0x2e0] sm:$0xf]  ;;  %v2657_v32 = vld [vmem:[#allocation7 + $0x2ec] sm:$0xf0]  ;;  %v2158_v33 = vor.u32 %v2625_v30, %v2157_v28  ;;  %s1865_s24 = sshll.u32 %s2911_s23, 4  ;;  %s1867_s27 = sshll.u32 %s3210_s6, 4  ;;  %s1866_s24 = int_to_ptr.vmem [resolvable:$true] %s1865_s24  ;;  %s1868_s27 = int_to_ptr.hbm [resolvable:$true] %s1867_s27 }
  0x20   :  { %186 = vmatpush.bf16.msra.mxu2 %v1890_v21  ;;  %199 = vmatpush.bf16.msra.mxu3 %v1894_v24  ;;  %v2286_v34 = vor.u32 %v2657_v32, %v2285_v31  ;;  %v2413_v35 = vld [vmem:[#allocation7 + $0x3e0] sm:$0xf]  ;;  %v2689_v36 = vld [vmem:[#allocation7 + $0x3ec] sm:$0xf0] }
  0x21   :  { %1911 = vmatmul.msk.bf16.vlgmr.msra.gmra.mxu0 %vm149_vm0, %v100_v25  ;;  %v2414_v37 = vor.u32 %v2689_v36, %v2413_v35  ;;  %v2013_v38 = vld [vmem:[#allocation7 + $0xc0] sm:$0xf]  ;;  %v2589_v39 = vld [vmem:[#allocation7 + $0xcc] sm:$0xf0] }
  0x22   :  { %1912 = vmatmul.msk.bf16.vlgmr.msra.gmra.mxu1 %vm149_vm0, %v100_v25  ;;  %1157 = vmatpush.bf16.msrb.mxu0 %v2030_v29  ;;  %v2141_v40 = vld [vmem:[#allocation7 + $0x1c0] sm:$0xf]  ;;  %v2014_v41 = vor.u32 %v2589_v39, %v2013_v38  ;;  %v2621_v42 = vld [vmem:[#allocation7 + $0x1cc] sm:$0xf0] }
  0x23   :  { %1913 = vmatmul.msk.bf16.vlgmr.msra.gmra.mxu2 %vm149_vm0, %v100_v25  ;;  %1914 = vmatmul.msk.bf16.vlgmr.msra.gmra.mxu3 %vm149_vm0, %v100_v25  ;;  %v2269_v43 = vld [vmem:[#allocation7 + $0x2c0] sm:$0xf]  ;;  %v2653_v44 = vld [vmem:[#allocation7 + $0x2cc] sm:$0xf0]  ;;  %v2142_v45 = vor.u32 %v2621_v42, %v2141_v40 }
  0x24   :  { %1170 = vmatpush.bf16.msrb.mxu1 %v2158_v33  ;;  %1183 = vmatpush.bf16.msrb.mxu2 %v2286_v34  ;;  %v2270_v46 = vor.u32 %v2653_v44, %v2269_v43  ;;  %v2397_v47 = vld [vmem:[#allocation7 + $0x3c0] sm:$0xf]  ;;  %v2685_v48 = vld [vmem:[#allocation7 + $0x3cc] sm:$0xf0] }
  0x25   :  { %1196 = vmatpush.bf16.msrb.mxu3 %v2414_v37  ;;  %v2398_v49 = vor.u32 %v2685_v48, %v2397_v47  ;;  %v1997_v50 = vld [vmem:[#allocation7 + $0xa0] sm:$0xf]  ;;  %v2585_v51 = vld [vmem:[#allocation7 + $0xac] sm:$0xf0] }
  0x26   :  { %1158 = vmatpush.bf16.msrb.mxu0 %v2014_v41  ;;  %v2125_v52 = vld [vmem:[#allocation7 + $0x1a0] sm:$0xf]  ;;  %v1998_v53 = vor.u32 %v2585_v51, %v1997_v50  ;;  %v2617_v54 = vld [vmem:[#allocation7 + $0x1ac] sm:$0xf0] }
  0x27   :  { %v2253_v55 = vld [vmem:[#allocation7 + $0x2a0] sm:$0xf]  ;;  %v2649_v56 = vld [vmem:[#allocation7 + $0x2ac] sm:$0xf0]  ;;  %v2126_v57 = vor.u32 %v2617_v54, %v2125_v52 }
  0x28   :  { %1171 = vmatpush.bf16.msrb.mxu1 %v2142_v45  ;;  %1184 = vmatpush.bf16.msrb.mxu2 %v2270_v46  ;;  %v2254_v58 = vor.u32 %v2649_v56, %v2253_v55  ;;  %v2381_v59 = vld [vmem:[#allocation7 + $0x3a0] sm:$0xf]  ;;  %v2681_v60 = vld [vmem:[#allocation7 + $0x3ac] sm:$0xf0] }
  0x29   :  { %1197 = vmatpush.bf16.msrb.mxu3 %v2398_v49  ;;  %v2382_v61 = vor.u32 %v2681_v60, %v2381_v59  ;;  %v1981_v62 = vld [vmem:[#allocation7 + $0x80] sm:$0xf]  ;;  %v2581_v63 = vld [vmem:[#allocation7 + $0x8c] sm:$0xf0] }
  0x2a   :  { %1159 = vmatpush.bf16.msrb.mxu0 %v1998_v53  ;;  %v2109_v0 = vld [vmem:[#allocation7 + $0x180] sm:$0xf]  ;;  %v1982_v1 = vor.u32 %v2581_v63, %v1981_v62  ;;  %v2613_v2 = vld [vmem:[#allocation7 + $0x18c] sm:$0xf0] }
  0x2b   :  { %v2237_v3 = vld [vmem:[#allocation7 + $0x280] sm:$0xf]  ;;  %v2645_v4 = vld [vmem:[#allocation7 + $0x28c] sm:$0xf0]  ;;  %v2110_v5 = vor.u32 %v2613_v2, %v2109_v0 }
  0x2c   :  { %1172 = vmatpush.bf16.msrb.mxu1 %v2126_v57  ;;  %1185 = vmatpush.bf16.msrb.mxu2 %v2254_v58  ;;  %v2238_v6 = vor.u32 %v2645_v4, %v2237_v3  ;;  %v2365_v7 = vld [vmem:[#allocation7 + $0x380] sm:$0xf]  ;;  %v2677_v8 = vld [vmem:[#allocation7 + $0x38c] sm:$0xf0] }
  0x2d   :  { %1198 = vmatpush.bf16.msrb.mxu3 %v2382_v61  ;;  %v2366_v9 = vor.u32 %v2677_v8, %v2365_v7  ;;  %v1965_v10 = vld [vmem:[#allocation7 + $0x60] sm:$0xf]  ;;  %v2577_v11 = vld [vmem:[#allocation7 + $0x6c] sm:$0xf0] }
  0x2e   :  { %1160 = vmatpush.bf16.msrb.mxu0 %v1982_v1  ;;  %v2093_v12 = vld [vmem:[#allocation7 + $0x160] sm:$0xf]  ;;  %v1966_v13 = vor.u32 %v2577_v11, %v1965_v10  ;;  %v2609_v14 = vld [vmem:[#allocation7 + $0x16c] sm:$0xf0] }
  0x2f   :  { %v2221_v15 = vld [vmem:[#allocation7 + $0x260] sm:$0xf]  ;;  %v2641_v16 = vld [vmem:[#allocation7 + $0x26c] sm:$0xf0]  ;;  %v2094_v17 = vor.u32 %v2609_v14, %v2093_v12 }
  0x30   :  { %1173 = vmatpush.bf16.msrb.mxu1 %v2110_v5  ;;  %1186 = vmatpush.bf16.msrb.mxu2 %v2238_v6  ;;  %v2222_v18 = vor.u32 %v2641_v16, %v2221_v15  ;;  %v2349_v19 = vld [vmem:[#allocation7 + $0x360] sm:$0xf]  ;;  %v2673_v20 = vld [vmem:[#allocation7 + $0x36c] sm:$0xf0] }
  0x31   :  { %1199 = vmatpush.bf16.msrb.mxu3 %v2366_v9  ;;  %v2350_v22 = vor.u32 %v2673_v20, %v2349_v19  ;;  %v1949_v26 = vld [vmem:[#allocation7 + $0x40] sm:$0xf]  ;;  %v2573_v27 = vld [vmem:[#allocation7 + $0x4c] sm:$0xf0] }
  0x32   :  { %1161 = vmatpush.bf16.msrb.mxu0 %v1966_v13  ;;  %v1950_v30 = vor.u32 %v2573_v27, %v1949_v26  ;;  %v2077_v31 = vld [vmem:[#allocation7 + $0x140] sm:$0xf]  ;;  %v2605_v32 = vld [vmem:[#allocation7 + $0x14c] sm:$0xf0] }
  0x33   :  { %v2078_v35 = vor.u32 %v2605_v32, %v2077_v31  ;;  %v2205_v36 = vld [vmem:[#allocation7 + $0x240] sm:$0xf]  ;;  %v2637_v37 = vld [vmem:[#allocation7 + $0x24c] sm:$0xf0] }
  0x34   :  { %1174 = vmatpush.bf16.msrb.mxu1 %v2094_v17  ;;  %1187 = vmatpush.bf16.msrb.mxu2 %v2222_v18  ;;  %v2206_v40 = vor.u32 %v2637_v37, %v2205_v36  ;;  %v2333_v41 = vld [vmem:[#allocation7 + $0x340] sm:$0xf]  ;;  %v2669_v42 = vld [vmem:[#allocation7 + $0x34c] sm:$0xf0] }
  0x35   :  { %1200 = vmatpush.bf16.msrb.mxu3 %v2350_v22  ;;  %v2334_v45 = vor.u32 %v2669_v42, %v2333_v41  ;;  %v1933_v46 = vld [vmem:[#allocation7 + $0x20] sm:$0xf]  ;;  %v2569_v47 = vld [vmem:[#allocation7 + $0x2c] sm:$0xf0] }
  0x36   :  { %1162 = vmatpush.bf16.msrb.mxu0 %v1950_v30  ;;  %v1934_v50 = vor.u32 %v2569_v47, %v1933_v46  ;;  %v2061_v51 = vld [vmem:[#allocation7 + $0x120] sm:$0xf]  ;;  %v2601_v52 = vld [vmem:[#allocation7 + $0x12c] sm:$0xf0] }
  0x37   :  { %v2062_v56 = vor.u32 %v2601_v52, %v2061_v51  ;;  %v2189_v36 = vld [vmem:[#allocation7 + $0x220] sm:$0xf]  ;;  %v2633_v37 = vld [vmem:[#allocation7 + $0x22c] sm:$0xf0] }
  0x38   :  { %1175 = vmatpush.bf16.msrb.mxu1 %v2078_v35  ;;  %1188 = vmatpush.bf16.msrb.mxu2 %v2206_v40  ;;  %v2317_v41 = vld [vmem:[#allocation7 + $0x320] sm:$0xf]  ;;  %v2665_v42 = vld [vmem:[#allocation7 + $0x32c] sm:$0xf0] }
  0x39   :  { %1201 = vmatpush.bf16.msrb.mxu3 %v2334_v45  ;;  %v1917_v46 = vld [vmem:[#allocation7] sm:$0xf]  ;;  %v2565_v47 = vld [vmem:[#allocation7 + $0xc] sm:$0xf0] }
  0x3a   :  { %1163 = vmatpush.bf16.msrb.mxu0 %v1934_v50  ;;  %v2045_v51 = vld [vmem:[#allocation7 + $0x100] sm:$0xf]  ;;  %v2597_v52 = vld [vmem:[#allocation7 + $0x10c] sm:$0xf0] }
  0x3c   :  { %1176 = vmatpush.bf16.msrb.mxu1 %v2062_v56 }
  0x9e   :  { %v2962_v21 = vpop.f32.mrf.mxu0 }
  0x9f   :  { %v208_v23 = vrot.slane %v2962_v21, 4  ;;  %v236_v24 = vmul.f32 %v2962_v21, %v2962_v21  ;;  %v2967_v25 = vpop.f32.mrf.mxu1 }
  0xa0   :  { %v214_v28 = vrot.slane %v2967_v25, 4  ;;  %v237_v29 = vmul.f32 %v2967_v25, %v2967_v25 }
  0xa1   :  { %v209_v33 = vadd.f32 %v208_v23, %v2962_v21  ;;  %v240_v34 = vrot.slane %v236_v24, 4 }
  0xa2   :  { %v215_v38 = vadd.f32 %v214_v28, %v2967_v25  ;;  %v246_v39 = vrot.slane %v237_v29, 4 }
  0xa3   :  { %v210_v43 = vrot.slane %v209_v33, 2  ;;  %v241_v44 = vadd.f32 %v240_v34, %v236_v24 }
  0xa4   :  { %v216_v48 = vrot.slane %v215_v38, 2  ;;  %v247_v49 = vadd.f32 %v246_v39, %v237_v29 }
  0xa5   :  { %v211_v53 = vadd.f32 %v210_v43, %v209_v33  ;;  %v242_v54 = vrot.slane %v241_v44, 2 }
  0xa6   :  { %v2974_v55 = vpop.f32.mrf.mxu2  ;;  %v217_v57 = vadd.f32 %v216_v48, %v215_v38  ;;  %v248_v58 = vrot.slane %v247_v49, 2  ;;  %v2979_v61 = vpop.f32.mrf.mxu3 }
  0xa7   :  { %v220_v59 = vrot.slane %v2974_v55, 4  ;;  %v238_v60 = vmul.f32 %v2974_v55, %v2974_v55  ;;  %v164_v62 = vpop.f32.mrf.mxu0  ;;  %v212_v63 = vrot.slane %v211_v53, 1  ;;  %v243_v0 = vadd.f32 %v242_v54, %v241_v44  ;;  %v177_v3 = vpop.f32.mrf.mxu1 }
  0xa8   :  { %v226_v1 = vrot.slane %v2979_v61, 4  ;;  %v239_v2 = vmul.f32 %v2979_v61, %v2979_v61  ;;  %v218_v4 = vrot.slane %v217_v57, 1  ;;  %v249_v5 = vadd.f32 %v248_v58, %v247_v49  ;;  %v2173_v58 = vld [vmem:[#allocation7 + $0x200] sm:$0xf]  ;;  %v2661_v62 = vld [vmem:[#allocation7 + $0x30c] sm:$0xf0] }
  0xa9   :  { %v221_v6 = vadd.f32 %v220_v59, %v2974_v55  ;;  %v252_v7 = vrot.slane %v238_v60, 4  ;;  %v213_v8 = vadd.f32 %v212_v63, %v211_v53  ;;  %v244_v9 = vrot.slane %v243_v0, 1  ;;  %v2629_v59 = vld [vmem:[#allocation7 + $0x20c] sm:$0xf0]  ;;  %v2591_v63 = vld [vmem:[#allocation7 + $0xe4] sm:$0xf] }
  0xaa   :  { %v227_v10 = vadd.f32 %v226_v1, %v2979_v61  ;;  %v258_v11 = vrot.slane %v239_v2, 4  ;;  %v219_v12 = vadd.f32 %v218_v4, %v217_v57  ;;  %v250_v13 = vrot.slane %v249_v5, 1 }
  0xab   :  { %v222_v14 = vrot.slane %v221_v6, 2  ;;  %v253_v15 = vadd.f32 %v252_v7, %v238_v60  ;;  %v2986_v16 = vmul.f32 0.125, %v213_v8  ;;  %v245_v17 = vadd.f32 %v244_v9, %v243_v0  ;;  %v2301_v60 = vld [vmem:[#allocation7 + $0x300] sm:$0xf]  ;;  %v2031_v0 = vld [vmem:[#allocation7 + $0xf0] sm:$0xf0] }
  0xac   :  { %v228_v18 = vrot.slane %v227_v10, 2  ;;  %v259_v19 = vadd.f32 %v258_v11, %v239_v2  ;;  %v2988_v20 = vmul.f32 0.125, %v219_v12  ;;  %v251_v22 = vadd.f32 %v250_v13, %v249_v5  ;;  %v2623_v5 = vld [vmem:[#allocation7 + $0x1e4] sm:$0xf]  ;;  %v2287_v12 = vld [vmem:[#allocation7 + $0x2f0] sm:$0xf0] }
  0xad   :  { %v223_v23 = vadd.f32 %v222_v14, %v221_v6  ;;  %v254_v24 = vrot.slane %v253_v15, 2  ;;  %v264_v26 = vmul.f32 0.125, %v245_v17  ;;  %v268_v27 = vmul.f32 %v2986_v16, %v2986_v16  ;;  %v2159_v6 = vld [vmem:[#allocation7 + $0x1f0] sm:$0xf0]  ;;  %v2655_v7 = vld [vmem:[#allocation7 + $0x2e4] sm:$0xf] }
  0xae   :  { %v229_v28 = vadd.f32 %v228_v18, %v227_v10  ;;  %v260_v29 = vrot.slane %v259_v19, 2  ;;  %v190_v30 = vpop.f32.mrf.mxu2  ;;  %v265_v31 = vmul.f32 0.125, %v251_v22  ;;  %v269_v32 = vmul.f32 %v2988_v20, %v2988_v20  ;;  %v203_v35 = vpop.f32.mrf.mxu3  ;;  %v2415_v17 = vld [vmem:[#allocation7 + $0x3f0] sm:$0xf0]  ;;  %v2587_v22 = vld [vmem:[#allocation7 + $0xc4] sm:$0xf] }
  0xaf   :  { %v224_v33 = vrot.slane %v223_v23, 1  ;;  %v255_v34 = vadd.f32 %v254_v24, %v253_v15  ;;  %v272_v38 = vsub.f32 %v264_v26, %v268_v27  ;;  %v2190_v57 = vor.u32 %v2633_v37, %v2189_v36  ;;  %v2687_v15 = vld [vmem:[#allocation7 + $0x3e4] sm:$0xf]  ;;  %v2143_v30 = vld [vmem:[#allocation7 + $0x1d0] sm:$0xf0] }
  0xb0   :  { %v230_v39 = vrot.slane %v229_v28, 1  ;;  %v261_v40 = vadd.f32 %v260_v29, %v259_v19  ;;  %v273_v43 = vsub.f32 %v265_v31, %v269_v32  ;;  %v2318_v4 = vor.u32 %v2665_v42, %v2317_v41  ;;  %v2619_v24 = vld [vmem:[#allocation7 + $0x1c4] sm:$0xf]  ;;  %v2271_v32 = vld [vmem:[#allocation7 + $0x2d0] sm:$0xf0] }
  0xb1   :  { %v225_v44 = vadd.f32 %v224_v33, %v223_v23  ;;  %v256_v45 = vrot.slane %v255_v34, 1  ;;  %v276_v48 = vmax.f32 %v272_v38, 0.0  ;;  %1189 = vmatpush.bf16.msrb.mxu2 %v2190_v57  ;;  %v1918_v11 = vor.u32 %v2565_v47, %v1917_v46  ;;  %v2015_v23 = vld [vmem:[#allocation7 + $0xd0] sm:$0xf0]  ;;  %v2651_v31 = vld [vmem:[#allocation7 + $0x2c4] sm:$0xf] }
  0xb2   :  { %v231_v49 = vadd.f32 %v230_v39, %v229_v28  ;;  %v262_v50 = vrot.slane %v261_v40, 1  ;;  %v277_v53 = vmax.f32 %v273_v43, 0.0  ;;  %1202 = vmatpush.bf16.msrb.mxu3 %v2318_v4  ;;  %v2046_v19 = vor.u32 %v2597_v52, %v2045_v51  ;;  %v2683_v37 = vld [vmem:[#allocation7 + $0x3c4] sm:$0xf]  ;;  %v2399_v38 = vld [vmem:[#allocation7 + $0x3d0] sm:$0xf0] }
  0xb3   :  { %v2994_v54 = vmul.f32 0.125, %v225_v44  ;;  %v257_v56 = vadd.f32 %v256_v45, %v255_v34  ;;  %v2996_v1 = vadd.f32 1e-05, %v276_v48  ;;  %1164 = vmatpush.bf16.msrb.mxu0 %v1918_v11  ;;  %v2174_v27 = vor.u32 %v2629_v59, %v2173_v58  ;;  %v1999_v44 = vld [vmem:[#allocation7 + $0xb0] sm:$0xf0] }
  0xb4   :  { %v2998_v2 = vmul.f32 0.125, %v231_v49  ;;  %v263_v3 = vadd.f32 %v262_v50, %v261_v40  ;;  %v3000_v8 = vadd.f32 1e-05, %v277_v53  ;;  %v2302_v28 = vor.u32 %v2661_v62, %v2301_v60  ;;  %1177 = vmatpush.bf16.msrb.mxu1 %v2046_v19  ;;  %v2583_v40 = vld [vmem:[#allocation7 + $0xa4] sm:$0xf] }
  0xb5   :  { %v266_v9 = vmul.f32 0.125, %v257_v56  ;;  %v270_v10 = vmul.f32 %v2994_v54, %v2994_v54  ;;  %2734 = vrsqrt.f32 %v2996_v1  ;;  %v2034_v29 = vor.u32 %v2591_v63, %v2031_v0  ;;  %1190 = vmatpush.bf16.msrb.mxu2 %v2174_v27  ;;  %v2615_v45 = vld [vmem:[#allocation7 + $0x1a4] sm:$0xf]  ;;  %v2127_v50 = vld [vmem:[#allocation7 + $0x1b0] sm:$0xf0] }
  0xb6   :  { %v267_v13 = vmul.f32 0.125, %v263_v3  ;;  %v271_v14 = vmul.f32 %v2998_v2, %v2998_v2  ;;  %2736 = vrsqrt.f32 %v3000_v8  ;;  %v2162_v34 = vor.u32 %v2623_v5, %v2159_v6  ;;  %1203 = vmatpush.bf16.msrb.mxu3 %v2302_v28  ;;  %v2647_v51 = vld [vmem:[#allocation7 + $0x2a4] sm:$0xf]  ;;  %v2255_v56 = vld [vmem:[#allocation7 + $0x2b0] sm:$0xf0] }
  0xb7   :  { %v274_v18 = vsub.f32 %v266_v9, %v270_v10  ;;  %v2290_v35 = vor.u32 %v2655_v7, %v2287_v12  ;;  %v2418_v36 = vor.u32 %v2687_v15, %v2415_v17  ;;  %1209 = vmatpush.bf16.msra.mxu0 %v2034_v29  ;;  %v2018_v42 = vor.u32 %v2587_v22, %v2015_v23  ;;  %v2679_v57 = vld [vmem:[#allocation7 + $0x3a4] sm:$0xf]  ;;  %v2383_v58 = vld [vmem:[#allocation7 + $0x3b0] sm:$0xf0] }
  0xb8   :  { %v275_v26 = vsub.f32 %v267_v13, %v271_v14  ;;  %1222 = vmatpush.bf16.msra.mxu1 %v2162_v34  ;;  %v2146_v43 = vor.u32 %v2619_v24, %v2143_v30  ;;  %v2274_v48 = vor.u32 %v2651_v31, %v2271_v32  ;;  %v2402_v49 = vor.u32 %v2683_v37, %v2399_v38  ;;  %v2579_v63 = vld [vmem:[#allocation7 + $0x84] sm:$0xf]  ;;  %v1983_v0 = vld [vmem:[#allocation7 + $0x90] sm:$0xf0] }
  0xb9   :  { %v278_v33 = vmax.f32 %v274_v18, 0.0  ;;  %1235 = vmatpush.bf16.msra.mxu2 %v2290_v35  ;;  %v2002_v60 = vor.u32 %v2583_v40, %v1999_v44  ;;  %v2130_v62 = vor.u32 %v2615_v45, %v2127_v50  ;;  %v2258_v4 = vor.u32 %v2647_v51, %v2255_v56  ;;  %v2611_v6 = vld [vmem:[#allocation7 + $0x184] sm:$0xf]  ;;  %v2111_v7 = vld [vmem:[#allocation7 + $0x190] sm:$0xf0] }
  0xba   :  { %v279_v39 = vmax.f32 %v275_v26, 0.0  ;;  %1248 = vmatpush.bf16.msra.mxu3 %v2418_v36  ;;  %v2386_v5 = vor.u32 %v2679_v57, %v2383_v58  ;;  %v2643_v9 = vld [vmem:[#allocation7 + $0x284] sm:$0xf]  ;;  %v2239_v11 = vld [vmem:[#allocation7 + $0x290] sm:$0xf0]  ;;  %v1986_v18 = vor.u32 %v2579_v63, %v1983_v0  ;;  %v2114_v19 = vor.u32 %v2611_v6, %v2111_v7 }
  0xbb   :  { %v3008_v41 = vadd.f32 1e-05, %v278_v33  ;;  %v3010_v46 = vpop.eup %2734  ;;  %1210 = vmatpush.bf16.msra.mxu0 %v2018_v42  ;;  %v2675_v12 = vld [vmem:[#allocation7 + $0x384] sm:$0xf]  ;;  %v2367_v13 = vld [vmem:[#allocation7 + $0x390] sm:$0xf0]  ;;  %v2242_v29 = vor.u32 %v2643_v9, %v2239_v11  ;;  %vm300_vm3 = vweird.f32 %v3000_v8  ;;  %vm290_vm11 = vweird.f32 %v2996_v1 }
  0xbc   :  { %v3012_v47 = vadd.f32 1e-05, %v279_v39  ;;  %v3014_v52 = vpop.eup %2736  ;;  %v285_v53 = vmul.f32 %v3010_v46, %v2996_v1  ;;  %1223 = vmatpush.bf16.msra.mxu1 %v2146_v43  ;;  %v2575_v15 = vld [vmem:[#allocation7 + $0x64] sm:$0xf]  ;;  %v1967_v22 = vld [vmem:[#allocation7 + $0x70] sm:$0xf0]  ;;  %v2370_v30 = vor.u32 %v2675_v12, %v2367_v13  ;;  %vm291_vm9 = vweird.f32 %v3010_v46 }
  0xbd   :  { %2738 = vrsqrt.f32 %v3008_v41  ;;  %v295_v59 = vmul.f32 %v3014_v52, %v3000_v8  ;;  %1236 = vmatpush.bf16.msra.mxu2 %v2274_v48  ;;  %v2607_v23 = vld [vmem:[#allocation7 + $0x164] sm:$0xf]  ;;  %v2095_v24 = vld [vmem:[#allocation7 + $0x170] sm:$0xf0]  ;;  %v1970_v38 = vor.u32 %v2575_v15, %v1967_v22  ;;  %vm301_vm1 = vweird.f32 %v3014_v52  ;;  %vm292_vm14 = vmor %vm290_vm11, %vm291_vm9 }
  0xbe   :  { %2740 = vrsqrt.f32 %v3012_v47  ;;  %1249 = vmatpush.bf16.msra.mxu3 %v2402_v49  ;;  %v286_v10 = vmul.f32 %v3010_v46, %v285_v53  ;;  %v2639_v31 = vld [vmem:[#allocation7 + $0x264] sm:$0xf]  ;;  %v2223_v32 = vld [vmem:[#allocation7 + $0x270] sm:$0xf0]  ;;  %v2098_v43 = vor.u32 %v2607_v23, %v2095_v24  ;;  %vm3040_vm4 = vmor %vm300_vm3, %vm301_vm1  ;;  %vm310_vm5 = vweird.f32 %v3008_v41 }
  0xbf   :  { %v296_v3 = vmul.f32 %v3014_v52, %v295_v59  ;;  %1211 = vmatpush.bf16.msra.mxu0 %v2002_v60  ;;  %v2671_v35 = vld [vmem:[#allocation7 + $0x364] sm:$0xf]  ;;  %v2351_v36 = vld [vmem:[#allocation7 + $0x370] sm:$0xf0]  ;;  %v2226_v50 = vor.u32 %v2639_v31, %v2223_v32  ;;  %vm320_vm10 = vweird.f32 %v3012_v47 }
  0xc0   :  { %1224 = vmatpush.bf16.msra.mxu1 %v2130_v62  ;;  %v287_v33 = vmul.f32 0.5, %v286_v10  ;;  %v2571_v39 = vld [vmem:[#allocation7 + $0x44] sm:$0xf]  ;;  %v1951_v44 = vld [vmem:[#allocation7 + $0x50] sm:$0xf0]  ;;  %v2354_v51 = vor.u32 %v2671_v35, %v2351_v36 }
  0xc1   :  { %v297_v14 = vmul.f32 0.5, %v296_v3  ;;  %1237 = vmatpush.bf16.msra.mxu2 %v2258_v4  ;;  %v2603_v45 = vld [vmem:[#allocation7 + $0x144] sm:$0xf]  ;;  %v2079_v48 = vld [vmem:[#allocation7 + $0x150] sm:$0xf0]  ;;  %v1954_v0 = vor.u32 %v2571_v39, %v1951_v44 }
  0xc2   :  { %1250 = vmatpush.bf16.msra.mxu3 %v2386_v5  ;;  %v2635_v53 = vld [vmem:[#allocation7 + $0x244] sm:$0xf]  ;;  %v2207_v56 = vld [vmem:[#allocation7 + $0x250] sm:$0xf0]  ;;  %v288_v57 = vsub.f32 1.5, %v287_v33  ;;  %v2082_v5 = vor.u32 %v2603_v45, %v2079_v48 }
  0xc3   :  { %v3024_v17 = vpop.eup %2738  ;;  %v298_v27 = vsub.f32 1.5, %v297_v14  ;;  %1212 = vmatpush.bf16.msra.mxu0 %v1986_v18  ;;  %v2667_v59 = vld [vmem:[#allocation7 + $0x344] sm:$0xf]  ;;  %v2335_v60 = vld [vmem:[#allocation7 + $0x350] sm:$0xf0]  ;;  %v2210_v9 = vor.u32 %v2635_v53, %v2207_v56 }
  0xc4   :  { %v3026_v26 = vpop.eup %2740  ;;  %v305_v28 = vmul.f32 %v3024_v17, %v3008_v41  ;;  %1225 = vmatpush.bf16.msra.mxu1 %v2114_v19  ;;  %vm311_vm2 = vweird.f32 %v3024_v17  ;;  %v2567_v6 = vld [vmem:[#allocation7 + $0x24] sm:$0xf]  ;;  %v1935_v41 = vld [vmem:[#allocation7 + $0x30] sm:$0xf0]  ;;  %v289_v13 = vmul.f32 %v3010_v46, %v288_v57 }
  0xc5   :  { %v315_v34 = vmul.f32 %v3026_v26, %v3012_v47  ;;  %v299_v40 = vmul.f32 %v3014_v52, %v298_v27  ;;  %1238 = vmatpush.bf16.msra.mxu2 %v2242_v29  ;;  %vm3050_vm7 = vmor %vm310_vm5, %vm311_vm2  ;;  %vm321_vm8 = vweird.f32 %v3026_v26  ;;  %v2599_v10 = vld [vmem:[#allocation7 + $0x124] sm:$0xf]  ;;  %v2063_v11 = vld [vmem:[#allocation7 + $0x130] sm:$0xf0]  ;;  %v1938_v47 = vor.u32 %v2567_v6, %v1935_v41 }
  0xc6   :  { %v306_v37 = vmul.f32 %v3024_v17, %v305_v28  ;;  %1251 = vmatpush.bf16.msra.mxu3 %v2370_v30  ;;  %v2631_v12 = vld [vmem:[#allocation7 + $0x224] sm:$0xf]  ;;  %v2191_v15 = vld [vmem:[#allocation7 + $0x230] sm:$0xf0]  ;;  %vm322_vm12 = vmor %vm320_vm10, %vm321_vm8  ;;  %v2066_v29 = vor.u32 %v2599_v10, %v2063_v11  ;;  %v293_v35 = vsel %vm292_vm14, %v3010_v46, %v289_v13 }
  0xc7   :  { %v316_v42 = vmul.f32 %v3026_v26, %v315_v34  ;;  %v303_v3 = vsel %vm3040_vm4, %v3014_v52, %v299_v40  ;;  %1213 = vmatpush.bf16.msra.mxu0 %v1970_v38  ;;  %v2338_v52 = vor.u32 %v2667_v59, %v2335_v60  ;;  %v2663_v18 = vld [vmem:[#allocation7 + $0x324] sm:$0xf]  ;;  %v2319_v19 = vld [vmem:[#allocation7 + $0x330] sm:$0xf0] }
  0xc8   :  { %v307_v49 = vmul.f32 0.5, %v306_v37  ;;  %1226 = vmatpush.bf16.msra.mxu1 %v2098_v43  ;;  %v328_v22 = vrot.slane %v303_v3, 7  ;;  %v205_v27 = vld [vmem:[#allocation10] ss:$4 sm:$0xf]  ;;  %v2322_v32 = vor.u32 %v2663_v18, %v2319_v19 }
  0xc9   :  { %v317_v58 = vmul.f32 0.5, %v316_v42  ;;  %1239 = vmatpush.bf16.msra.mxu2 %v2226_v50  ;;  %v2563_v30 = vld [vmem:[#allocation7 + $0x4] sm:$0xf]  ;;  %v1919_v31 = vld [vmem:[#allocation7 + $0x10] sm:$0xf0] }
  0xca   :  { %v308_v63 = vsub.f32 1.5, %v307_v49  ;;  %1252 = vmatpush.bf16.msra.mxu3 %v2354_v51  ;;  %v2595_v33 = vld [vmem:[#allocation7 + $0x104] sm:$0xf]  ;;  %v2047_v34 = vld [vmem:[#allocation7 + $0x110] sm:$0xf0]  ;;  %v332_v37 = vsel %vm331_vm6, %v293_v35, %v328_v22  ;;  %v1922_v43 = vor.u32 %v2563_v30, %v1919_v31 }
  0xcb   :  { %v318_v4 = vsub.f32 1.5, %v317_v58  ;;  %1214 = vmatpush.bf16.msra.mxu0 %v1954_v0  ;;  %v2175_v36 = vld [vmem:[#allocation7 + $0x210] sm:$0xf0]  ;;  %v2659_v39 = vld [vmem:[#allocation7 + $0x304] sm:$0xf]  ;;  %v2050_v44 = vor.u32 %v2595_v33, %v2047_v34 }
  0xcc   :  { %v309_v7 = vmul.f32 %v3024_v17, %v308_v63  ;;  %1227 = vmatpush.bf16.msra.mxu1 %v2082_v5  ;;  %v2303_v40 = vld [vmem:[#allocation7 + $0x310] sm:$0xf0]  ;;  %v207_v0 = vld [vmem:[#allocation10 + $0x1] ss:$4 sm:$0xf] }
  0xcd   :  { %v319_v14 = vmul.f32 %v3026_v26, %v318_v4  ;;  %1240 = vmatpush.bf16.msra.mxu2 %v2210_v9  ;;  %v2306_v49 = vor.u32 %v2659_v39, %v2303_v40  ;;  %v2626_v18 = vld [vmem:[#allocation7 + $0x1f4] sm:$0xf0]  ;;  %v2293_v19 = vld [vmem:[#allocation7 + $0x2e8] sm:$0xf] }
  0xce   :  { %v313_v23 = vsel %vm3050_vm7, %v3024_v17, %v309_v7  ;;  %1253 = vmatpush.bf16.msra.mxu3 %v2338_v52  ;;  %v2194_v17 = vor.u32 %v2631_v12, %v2191_v15  ;;  %v2037_v52 = vld [vmem:[#allocation7 + $0xe8] sm:$0xf]  ;;  %v2622_v35 = vld [vmem:[#allocation7 + $0x1d4] sm:$0xf0] }
  0xcf   :  { %v329_v24 = vrot.slane %v313_v23, 6  ;;  %v323_v28 = vsel %vm322_vm12, %v3026_v26, %v319_v14  ;;  %v2627_v26 = vld [vmem:[#allocation7 + $0x204] sm:$0xf]  ;;  %1215 = vmatpush.bf16.msra.mxu0 %v1938_v47  ;;  %v2594_v14 = vld [vmem:[#allocation7 + $0xf4] sm:$0xf0] }
  0xd0   :  { %v330_v1 = vrot.slane %v323_v28, 5  ;;  %1228 = vmatpush.bf16.msra.mxu1 %v2066_v29  ;;  %v2178_v48 = vor.u32 %v2627_v26, %v2175_v36  ;;  %v2165_v15 = vld [vmem:[#allocation7 + $0x1e8] sm:$0xf]  ;;  %v2654_v36 = vld [vmem:[#allocation7 + $0x2d4] sm:$0xf0] }
  0xd1   :  { %1241 = vmatpush.bf16.msra.mxu2 %v2194_v17  ;;  %v2421_v22 = vld [vmem:[#allocation7 + $0x3e8] sm:$0xf]  ;;  %v2166_v28 = vor.u32 %v2626_v18, %v2165_v15  ;;  %v2590_v17 = vld [vmem:[#allocation7 + $0xd4] sm:$0xf0] }
  0xd2   :  { %v334_v38 = vsel %vm333_vm13, %v329_v24, %v330_v1  ;;  %1254 = vmatpush.bf16.msra.mxu3 %v2322_v32  ;;  %v2021_v1 = vld [vmem:[#allocation7 + $0xc8] sm:$0xf]  ;;  %v2574_v18 = vld [vmem:[#allocation7 + $0x54] sm:$0xf0] }
  0xd3   :  { %v336_v42 = vsel %vm335_vm15, %v332_v37, %v334_v38  ;;  %1216 = vmatpush.bf16.msra.mxu0 %v1922_v43  ;;  %v2149_v34 = vld [vmem:[#allocation7 + $0x1c8] sm:$0xf]  ;;  %v2686_v38 = vld [vmem:[#allocation7 + $0x3d4] sm:$0xf0]  ;;  %v2022_v39 = vor.u32 %v2590_v17, %v2021_v1 }
  0xd4   :  { %v338_v45 = vmul.f32 %v336_v42, %v205_v27  ;;  %1229 = vmatpush.bf16.msra.mxu1 %v2050_v44  ;;  %v2038_v27 = vor.u32 %v2594_v14, %v2037_v52  ;;  %v2277_v26 = vld [vmem:[#allocation7 + $0x2c8] sm:$0xf]  ;;  %v2150_v40 = vor.u32 %v2622_v35, %v2149_v34  ;;  %v2586_v43 = vld [vmem:[#allocation7 + $0xb4] sm:$0xf0] }
  0xd5   :  { %1242 = vmatpush.bf16.msra.mxu2 %v2178_v48  ;;  %v2405_v37 = vld [vmem:[#allocation7 + $0x3c8] sm:$0xf]  ;;  %v2278_v44 = vor.u32 %v2654_v36, %v2277_v26  ;;  %v2570_v17 = vld [vmem:[#allocation7 + $0x34] sm:$0xf0] }
  0xd6   :  { %v340_v46 = vperm.slane %v338_v45, 0  ;;  %v341_v50 = vperm.slane %v338_v45, 1  ;;  %v342_v51 = vperm.slane %v338_v45, 2  ;;  %v343_v53 = vperm.slane %v338_v45, 3  ;;  %1255 = vmatpush.bf16.msra.mxu3 %v2306_v49  ;;  %v2005_v42 = vld [vmem:[#allocation7 + $0xa8] sm:$0xf] }
  0xd7   :  { %v2406_v45 = vor.u32 %v2686_v38, %v2405_v37  ;;  %v2133_v48 = vld [vmem:[#allocation7 + $0x1a8] sm:$0xf]  ;;  %v2618_v49 = vld [vmem:[#allocation7 + $0x1b4] sm:$0xf0] }
  0xd8   :  { %v349_v56 = vmul.f32 %v341_v50, %v2988_v20  ;;  %v350_v57 = vmul.f32 %v342_v51, %v2994_v54  ;;  %v351_v58 = vmul.f32 %v343_v53, %v2998_v2  ;;  %v348_v59 = vmul.f32 %v340_v46, %v2986_v16  ;;  %v2229_v52 = vld [vmem:[#allocation7 + $0x268] sm:$0xf]  ;;  %v2602_v35 = vld [vmem:[#allocation7 + $0x134] sm:$0xf0] }
  0xd9   :  { %v367_v20 = vmul.f32 %v343_v53, %v2979_v61  ;;  %v364_v54 = vmul.f32 %v340_v46, %v2962_v21  ;;  %v365_v2 = vmul.f32 %v341_v50, %v2967_v25  ;;  %v366_v6 = vmul.f32 %v342_v51, %v2974_v55  ;;  %v2658_v61 = vld [vmem:[#allocation7 + $0x2f4] sm:$0xf0]  ;;  %v2261_v46 = vld [vmem:[#allocation7 + $0x2a8] sm:$0xf] }
  0xda   :  { %v356_v60 = vrot.slane %v349_v56, 7  ;;  %v357_v62 = vrot.slane %v350_v57, 6  ;;  %v358_v63 = vrot.slane %v351_v58, 5  ;;  %v2690_v55 = vld [vmem:[#allocation7 + $0x3f4] sm:$0xf0]  ;;  %v2294_v32 = vor.u32 %v2658_v61, %v2293_v19 }
  0xdb   :  { %v2422_v33 = vor.u32 %v2690_v55, %v2421_v22  ;;  %v2650_v50 = vld [vmem:[#allocation7 + $0x2b4] sm:$0xf0]  ;;  %v2389_v51 = vld [vmem:[#allocation7 + $0x3a8] sm:$0xf]  ;;  %v2006_v56 = vor.u32 %v2586_v43, %v2005_v42  ;;  %v2134_v57 = vor.u32 %v2618_v49, %v2133_v48 }
  0xdc   :  { %v359_v3 = vsel %vm331_vm6, %v348_v59, %v356_v60  ;;  %v360_v8 = vsel %vm333_vm13, %v357_v62, %v358_v63  ;;  %v2682_v53 = vld [vmem:[#allocation7 + $0x3b4] sm:$0xf0]  ;;  %v1989_v58 = vld [vmem:[#allocation7 + $0x88] sm:$0xf]  ;;  %v2262_v60 = vor.u32 %v2650_v50, %v2261_v46 }
  0xdd   :  { %v361_v4 = vsel %vm335_vm15, %v359_v3, %v360_v8  ;;  %v2582_v59 = vld [vmem:[#allocation7 + $0x94] sm:$0xf0]  ;;  %v2390_v62 = vor.u32 %v2682_v53, %v2389_v51  ;;  %v2117_v63 = vld [vmem:[#allocation7 + $0x188] sm:$0xf] }
  0xde   :  { %v363_v5 = vsub.f32 %v207_v0, %v361_v4  ;;  %v2614_v0 = vld [vmem:[#allocation7 + $0x194] sm:$0xf0]  ;;  %v2245_v3 = vld [vmem:[#allocation7 + $0x288] sm:$0xf] }
  0xdf   :  { %v2646_v8 = vld [vmem:[#allocation7 + $0x294] sm:$0xf0]  ;;  %v2373_v4 = vld [vmem:[#allocation7 + $0x388] sm:$0xf] }
  0xe0   :  { %v372_v16 = vperm.slane %v363_v5, 3  ;;  %v369_v41 = vperm.slane %v363_v5, 0  ;;  %v370_v7 = vperm.slane %v363_v5, 1  ;;  %v371_v9 = vperm.slane %v363_v5, 2  ;;  %v2678_v5 = vld [vmem:[#allocation7 + $0x394] sm:$0xf0] }
  0xe1   :  { %v1957_v15 = vld [vmem:[#allocation7 + $0x48] sm:$0xf]  ;;  %v2670_v55 = vld [vmem:[#allocation7 + $0x354] sm:$0xf0] }
  0xe2   :  { %v380_v10 = vadd.f32 %v372_v16, %v367_v20  ;;  %v377_v11 = vadd.f32 %v369_v41, %v364_v54  ;;  %v378_v12 = vadd.f32 %v370_v7, %v365_v2  ;;  %v379_v13 = vadd.f32 %v371_v9, %v366_v6  ;;  %v1973_v2 = vld [vmem:[#allocation7 + $0x68] sm:$0xf]  ;;  %v2578_v6 = vld [vmem:[#allocation7 + $0x74] sm:$0xf0] }
  0xe3   :  { %v1990_v20 = vor.u32 %v2582_v59, %v1989_v58  ;;  %v2118_v54 = vor.u32 %v2614_v0, %v2117_v63  ;;  %v2246_v16 = vor.u32 %v2646_v8, %v2245_v3  ;;  %v2374_v41 = vor.u32 %v2678_v5, %v2373_v4  ;;  %v2101_v7 = vld [vmem:[#allocation7 + $0x168] sm:$0xf]  ;;  %v2610_v9 = vld [vmem:[#allocation7 + $0x174] sm:$0xf0]  ;;  %v2624_v58 = vld [vmem:[#allocation7 + $0x1ec] sm:$0xf] }
  0xe4   :  { %v381_v21 = vmax.f32 %v377_v11, 0.0  ;;  %v382_v23 = vmax.f32 %v378_v12, 0.0  ;;  %v383_v25 = vmax.f32 %v379_v13, 0.0  ;;  %v384_v24 = vmax.f32 %v380_v10, 0.0  ;;  %v2642_v10 = vld [vmem:[#allocation7 + $0x274] sm:$0xf0] }
  0xe5   :  { %v2357_v11 = vld [vmem:[#allocation7 + $0x368] sm:$0xf]  ;;  %v2674_v12 = vld [vmem:[#allocation7 + $0x374] sm:$0xf0]  ;;  %v1974_v13 = vor.u32 %v2578_v6, %v1973_v2  ;;  %v2102_v14 = vor.u32 %v2610_v9, %v2101_v7  ;;  %v2230_v19 = vor.u32 %v2642_v10, %v2229_v52  ;;  %v2167_v59 = vld [vmem:[#allocation7 + $0x1f8] sm:$0xf0] }
  0xe6   :  { %v3084_v47 = vpack.c.bf16 %v381_v21, %v381_v21  ;;  %v3086_v29 = vpack.c.bf16 %v382_v23, %v382_v23  ;;  %v3088_v30 = vpack.c.bf16 %v383_v25, %v383_v25  ;;  %v3090_v31 = vpack.c.bf16 %v384_v24, %v384_v24  ;;  %v2085_v22 = vld [vmem:[#allocation7 + $0x148] sm:$0xf]  ;;  %v2606_v21 = vld [vmem:[#allocation7 + $0x154] sm:$0xf0]  ;;  %v2295_v0 = vld [vmem:[#allocation7 + $0x2f8] sm:$0xf0] }
  0xe7   :  { %v2358_v61 = vor.u32 %v2674_v12, %v2357_v11  ;;  %v2213_v23 = vld [vmem:[#allocation7 + $0x248] sm:$0xf]  ;;  %v2638_v25 = vld [vmem:[#allocation7 + $0x254] sm:$0xf0]  ;;  %v2688_v3 = vld [vmem:[#allocation7 + $0x3ec] sm:$0xf] }
  0xe8   :  { %1165 = vmatmul.bf16.vlgmr.msrb.gmra.mxu0 %v3084_v47  ;;  %1178 = vmatmul.bf16.vlgmr.msrb.gmra.mxu1 %v3086_v29  ;;  %v2341_v24 = vld [vmem:[#allocation7 + $0x348] sm:$0xf]  ;;  %v2634_v36 = vld [vmem:[#allocation7 + $0x234] sm:$0xf0]  ;;  %v2423_v8 = vld [vmem:[#allocation7 + $0x3f8] sm:$0xf0] }
  0xe9   :  { %1191 = vmatmul.bf16.vlgmr.msrb.gmra.mxu2 %v3088_v30  ;;  %1204 = vmatmul.bf16.vlgmr.msrb.gmra.mxu3 %v3090_v31  ;;  %v1941_v1 = vld [vmem:[#allocation7 + $0x28] sm:$0xf]  ;;  %v2666_v38 = vld [vmem:[#allocation7 + $0x334] sm:$0xf0]  ;;  %v2588_v2 = vld [vmem:[#allocation7 + $0xcc] sm:$0xf] }
  0xea   :  { %1261 = vmatpush.bf16.msrb.mxu0 %v2038_v27  ;;  %1274 = vmatpush.bf16.msrb.mxu1 %v2166_v28  ;;  %v1958_v27 = vor.u32 %v2574_v18, %v1957_v15  ;;  %v2086_v28 = vor.u32 %v2606_v21, %v2085_v22  ;;  %v2069_v34 = vld [vmem:[#allocation7 + $0x128] sm:$0xf]  ;;  %v2566_v43 = vld [vmem:[#allocation7 + $0x14] sm:$0xf0]  ;;  %v2023_v6 = vld [vmem:[#allocation7 + $0xd8] sm:$0xf0] }
  0xeb   :  { %1287 = vmatpush.bf16.msrb.mxu2 %v2294_v32  ;;  %1300 = vmatpush.bf16.msrb.mxu3 %v2422_v33  ;;  %v2214_v32 = vor.u32 %v2638_v25, %v2213_v23  ;;  %v2342_v33 = vor.u32 %v2670_v55, %v2341_v24  ;;  %v2197_v26 = vld [vmem:[#allocation7 + $0x228] sm:$0xf]  ;;  %v2070_v42 = vor.u32 %v2602_v35, %v2069_v34  ;;  %v2630_v50 = vld [vmem:[#allocation7 + $0x214] sm:$0xf0]  ;;  %v2620_v7 = vld [vmem:[#allocation7 + $0x1cc] sm:$0xf] }
  0xec   :  { %v2325_v37 = vld [vmem:[#allocation7 + $0x328] sm:$0xf]  ;;  %v2198_v48 = vor.u32 %v2634_v36, %v2197_v26  ;;  %v2662_v53 = vld [vmem:[#allocation7 + $0x314] sm:$0xf0]  ;;  %v2151_v9 = vld [vmem:[#allocation7 + $0x1d8] sm:$0xf0] }
  0xed   :  { %v2326_v49 = vor.u32 %v2666_v38, %v2325_v37  ;;  %v2181_v46 = vld [vmem:[#allocation7 + $0x208] sm:$0xf]  ;;  %v2652_v52 = vld [vmem:[#allocation7 + $0x2cc] sm:$0xf]  ;;  %v2279_v10 = vld [vmem:[#allocation7 + $0x2d8] sm:$0xf0] }
  0xee   :  { %1262 = vmatpush.bf16.msrb.mxu0 %v2022_v39  ;;  %1275 = vmatpush.bf16.msrb.mxu1 %v2150_v40  ;;  %v1925_v39 = vld [vmem:[#allocation7 + $0x8] sm:$0xf]  ;;  %v1942_v40 = vor.u32 %v2570_v17, %v1941_v1  ;;  %v2182_v4 = vor.u32 %v2630_v50, %v2181_v46  ;;  %v2684_v11 = vld [vmem:[#allocation7 + $0x3cc] sm:$0xf]  ;;  %v2407_v12 = vld [vmem:[#allocation7 + $0x3d8] sm:$0xf0] }
  0xef   :  { %1288 = vmatpush.bf16.msrb.mxu2 %v2278_v44  ;;  %1301 = vmatpush.bf16.msrb.mxu3 %v2406_v45  ;;  %v2053_v44 = vld [vmem:[#allocation7 + $0x108] sm:$0xf]  ;;  %v2598_v45 = vld [vmem:[#allocation7 + $0x114] sm:$0xf0]  ;;  %v2584_v15 = vld [vmem:[#allocation7 + $0xac] sm:$0xf] }
  0xf0   :  { %v2309_v51 = vld [vmem:[#allocation7 + $0x308] sm:$0xf]  ;;  %v2054_v63 = vor.u32 %v2598_v45, %v2053_v44  ;;  %v2007_v18 = vld [vmem:[#allocation7 + $0xb8] sm:$0xf0]  ;;  %v2616_v22 = vld [vmem:[#allocation7 + $0x1ac] sm:$0xf] }
  0xf1   :  { %v2310_v5 = vor.u32 %v2662_v53, %v2309_v51  ;;  %v2135_v21 = vld [vmem:[#allocation7 + $0x1b8] sm:$0xf0]  ;;  %v2648_v23 = vld [vmem:[#allocation7 + $0x2ac] sm:$0xf] }
  0xf2   :  { %1263 = vmatpush.bf16.msrb.mxu0 %v2006_v56  ;;  %1276 = vmatpush.bf16.msrb.mxu1 %v2134_v57  ;;  %v2592_v56 = vld [vmem:[#allocation7 + $0xec] sm:$0xf]  ;;  %v2039_v57 = vld [vmem:[#allocation7 + $0xf8] sm:$0xf0] }
  0xf3   :  { %1289 = vmatpush.bf16.msrb.mxu2 %v2262_v60  ;;  %1302 = vmatpush.bf16.msrb.mxu3 %v2390_v62  ;;  %v2656_v60 = vld [vmem:[#allocation7 + $0x2ec] sm:$0xf]  ;;  %v1926_v62 = vor.u32 %v2566_v43, %v1925_v39  ;;  %v2263_v25 = vld [vmem:[#allocation7 + $0x2b8] sm:$0xf0] }
  0xf4   :  { %v2680_v24 = vld [vmem:[#allocation7 + $0x3ac] sm:$0xf]  ;;  %v2391_v55 = vld [vmem:[#allocation7 + $0x3b8] sm:$0xf0] }
  0xf5   :  { %v2580_v1 = vld [vmem:[#allocation7 + $0x8c] sm:$0xf]  ;;  %v1991_v17 = vld [vmem:[#allocation7 + $0x98] sm:$0xf0] }
  0xf6   :  { %1264 = vmatpush.bf16.msrb.mxu0 %v1990_v20  ;;  %1277 = vmatpush.bf16.msrb.mxu1 %v2118_v54  ;;  %v2042_v20 = vor.u32 %v2592_v56, %v2039_v57  ;;  %v2170_v54 = vor.u32 %v2624_v58, %v2167_v59  ;;  %v2612_v34 = vld [vmem:[#allocation7 + $0x18c] sm:$0xf]  ;;  %v2119_v35 = vld [vmem:[#allocation7 + $0x198] sm:$0xf0]  ;;  %v1994_v39 = vor.u32 %v2580_v1, %v1991_v17 }
  0xf7   :  { %1290 = vmatpush.bf16.msrb.mxu2 %v2246_v16  ;;  %1303 = vmatpush.bf16.msrb.mxu3 %v2374_v41  ;;  %v2298_v16 = vor.u32 %v2656_v60, %v2295_v0  ;;  %v2426_v41 = vor.u32 %v2688_v3, %v2423_v8  ;;  %v2644_v26 = vld [vmem:[#allocation7 + $0x28c] sm:$0xf]  ;;  %v2247_v36 = vld [vmem:[#allocation7 + $0x298] sm:$0xf0] }
  0xf8   :  { %1217 = vmatmul.bf16.vlgmr.msra.gmra.mxu0 %v3084_v47  ;;  %1230 = vmatmul.bf16.vlgmr.msra.gmra.mxu1 %v3086_v29  ;;  %v2676_v37 = vld [vmem:[#allocation7 + $0x38c] sm:$0xf]  ;;  %v2375_v38 = vld [vmem:[#allocation7 + $0x398] sm:$0xf0]  ;;  %v2250_v44 = vor.u32 %v2644_v26, %v2247_v36 }
  0xf9   :  { %1243 = vmatmul.bf16.vlgmr.msra.gmra.mxu2 %v3088_v30  ;;  %1256 = vmatmul.bf16.vlgmr.msra.gmra.mxu3 %v3090_v31  ;;  %v1975_v43 = vld [vmem:[#allocation7 + $0x78] sm:$0xf0]  ;;  %v2378_v45 = vor.u32 %v2676_v37, %v2375_v38  ;;  %v2640_v46 = vld [vmem:[#allocation7 + $0x26c] sm:$0xf] }
  0xfa   :  { %1265 = vmatpush.bf16.msrb.mxu0 %v1974_v13  ;;  %1278 = vmatpush.bf16.msrb.mxu1 %v2102_v14  ;;  %v2026_v13 = vor.u32 %v2588_v2, %v2023_v6  ;;  %v2154_v14 = vor.u32 %v2620_v7, %v2151_v9  ;;  %v2231_v50 = vld [vmem:[#allocation7 + $0x278] sm:$0xf0]  ;;  %v2672_v51 = vld [vmem:[#allocation7 + $0x36c] sm:$0xf] }
  0xfb   :  { %1291 = vmatpush.bf16.msrb.mxu2 %v2230_v19  ;;  %1304 = vmatpush.bf16.msrb.mxu3 %v2358_v61  ;;  %v2282_v19 = vor.u32 %v2652_v52, %v2279_v10  ;;  %v2410_v61 = vor.u32 %v2684_v11, %v2407_v12  ;;  %v2359_v53 = vld [vmem:[#allocation7 + $0x378] sm:$0xf0]  ;;  %v2572_v58 = vld [vmem:[#allocation7 + $0x4c] sm:$0xf]  ;;  %v2234_v60 = vor.u32 %v2640_v46, %v2231_v50 }
  0xfc   :  { %v1959_v59 = vld [vmem:[#allocation7 + $0x58] sm:$0xf0]  ;;  %v2636_v3 = vld [vmem:[#allocation7 + $0x24c] sm:$0xf] }
  0xfd   :  { %v2087_v0 = vld [vmem:[#allocation7 + $0x158] sm:$0xf0]  ;;  %v2568_v2 = vld [vmem:[#allocation7 + $0x2c] sm:$0xf] }
  0xfe   :  { %1266 = vmatpush.bf16.msrb.mxu0 %v1958_v27  ;;  %1279 = vmatpush.bf16.msrb.mxu1 %v2086_v28  ;;  %v2010_v27 = vor.u32 %v2584_v15, %v2007_v18  ;;  %v2138_v28 = vor.u32 %v2616_v22, %v2135_v21  ;;  %v2215_v8 = vld [vmem:[#allocation7 + $0x258] sm:$0xf0]  ;;  %v2600_v7 = vld [vmem:[#allocation7 + $0x12c] sm:$0xf] }
  0xff   :  { %1292 = vmatpush.bf16.msrb.mxu2 %v2214_v32  ;;  %1305 = vmatpush.bf16.msrb.mxu3 %v2342_v33  ;;  %v2266_v32 = vor.u32 %v2648_v23, %v2263_v25  ;;  %v2394_v33 = vor.u32 %v2680_v24, %v2391_v55  ;;  %v1943_v6 = vld [vmem:[#allocation7 + $0x38] sm:$0xf0]  ;;  %v2632_v52 = vld [vmem:[#allocation7 + $0x22c] sm:$0xf] }
 0x100   :  { %v2071_v9 = vld [vmem:[#allocation7 + $0x138] sm:$0xf0]  ;;  %v2664_v11 = vld [vmem:[#allocation7 + $0x32c] sm:$0xf] }
 0x101   :  { %v2199_v10 = vld [vmem:[#allocation7 + $0x238] sm:$0xf0]  ;;  %v2564_v15 = vld [vmem:[#allocation7 + $0xc] sm:$0xf] }
 0x102   :  { %1267 = vmatpush.bf16.msrb.mxu0 %v1942_v40  ;;  %1280 = vmatpush.bf16.msrb.mxu1 %v2070_v42  ;;  %v2122_v40 = vor.u32 %v2612_v34, %v2119_v35  ;;  %v2576_v42 = vld [vmem:[#allocation7 + $0x6c] sm:$0xf]  ;;  %v2327_v12 = vld [vmem:[#allocation7 + $0x338] sm:$0xf0] }
 0x103   :  { %1293 = vmatpush.bf16.msrb.mxu2 %v2198_v48  ;;  %1306 = vmatpush.bf16.msrb.mxu3 %v2326_v49  ;;  %v2608_v48 = vld [vmem:[#allocation7 + $0x16c] sm:$0xf]  ;;  %v2103_v49 = vld [vmem:[#allocation7 + $0x178] sm:$0xf0]  ;;  %v1978_v56 = vor.u32 %v2576_v42, %v1975_v43 }
 0x104   :  { %v2106_v57 = vor.u32 %v2608_v48, %v2103_v49  ;;  %v1927_v18 = vld [vmem:[#allocation7 + $0x18] sm:$0xf0]  ;;  %v2596_v22 = vld [vmem:[#allocation7 + $0x10c] sm:$0xf] }
 0x105   :  { %v2055_v21 = vld [vmem:[#allocation7 + $0x118] sm:$0xf0]  ;;  %v2628_v23 = vld [vmem:[#allocation7 + $0x20c] sm:$0xf] }
 0x106   :  { %1268 = vmatpush.bf16.msrb.mxu0 %v1926_v62  ;;  %1281 = vmatpush.bf16.msrb.mxu1 %v2054_v63  ;;  %v2362_v62 = vor.u32 %v2672_v51, %v2359_v53  ;;  %v2604_v63 = vld [vmem:[#allocation7 + $0x14c] sm:$0xf]  ;;  %v2183_v25 = vld [vmem:[#allocation7 + $0x218] sm:$0xf0] }
 0x107   :  { %1294 = vmatpush.bf16.msrb.mxu2 %v2182_v4  ;;  %1307 = vmatpush.bf16.msrb.mxu3 %v2310_v5  ;;  %v2668_v4 = vld [vmem:[#allocation7 + $0x34c] sm:$0xf]  ;;  %v2343_v5 = vld [vmem:[#allocation7 + $0x358] sm:$0xf0]  ;;  %v2186_v1 = vor.u32 %v2628_v23, %v2183_v25 }
 0x108   :  { %v2660_v24 = vld [vmem:[#allocation7 + $0x30c] sm:$0xf]  ;;  %v2311_v55 = vld [vmem:[#allocation7 + $0x318] sm:$0xf0] }
 0x109   :  { %1269 = vmatmul.bf16.vlgmr.msrb.gmra.mxu0 %v3084_v47  ;;  %1282 = vmatmul.bf16.vlgmr.msrb.gmra.mxu1 %v3086_v29  ;;  %v2314_v17 = vor.u32 %v2660_v24, %v2311_v55 }
 0x10a   :  { %1313 = vmatpush.bf16.msra.mxu0 %v2042_v20  ;;  %1326 = vmatpush.bf16.msra.mxu1 %v2170_v54  ;;  %v1962_v20 = vor.u32 %v2572_v58, %v1959_v59  ;;  %v2090_v54 = vor.u32 %v2604_v63, %v2087_v0 }
 0x10b   :  { %1339 = vmatpush.bf16.msra.mxu2 %v2298_v16  ;;  %1352 = vmatpush.bf16.msra.mxu3 %v2426_v41  ;;  %v2218_v16 = vor.u32 %v2636_v3, %v2215_v8  ;;  %v2346_v41 = vor.u32 %v2668_v4, %v2343_v5 }
 0x10c   :  { %1295 = vmatmul.bf16.vlgmr.msrb.gmra.mxu2 %v3088_v30  ;;  %1308 = vmatmul.bf16.vlgmr.msrb.gmra.mxu3 %v3090_v31 }
 0x10e   :  { %1314 = vmatpush.bf16.msra.mxu0 %v2026_v13  ;;  %1327 = vmatpush.bf16.msra.mxu1 %v2154_v14  ;;  %v1946_v13 = vor.u32 %v2568_v2, %v1943_v6  ;;  %v2074_v14 = vor.u32 %v2600_v7, %v2071_v9 }
 0x10f   :  { %1340 = vmatpush.bf16.msra.mxu2 %v2282_v19  ;;  %1353 = vmatpush.bf16.msra.mxu3 %v2410_v61  ;;  %v2202_v19 = vor.u32 %v2632_v52, %v2199_v10  ;;  %v2330_v61 = vor.u32 %v2664_v11, %v2327_v12 }
 0x112   :  { %1315 = vmatpush.bf16.msra.mxu0 %v2010_v27  ;;  %1328 = vmatpush.bf16.msra.mxu1 %v2138_v28  ;;  %v1930_v27 = vor.u32 %v2564_v15, %v1927_v18  ;;  %v2058_v28 = vor.u32 %v2596_v22, %v2055_v21 }
 0x113   :  { %1341 = vmatpush.bf16.msra.mxu2 %v2266_v32  ;;  %1354 = vmatpush.bf16.msra.mxu3 %v2394_v33 }
 0x116   :  { %1316 = vmatpush.bf16.msra.mxu0 %v1994_v39  ;;  %1329 = vmatpush.bf16.msra.mxu1 %v2122_v40 }
 0x117   :  { %1342 = vmatpush.bf16.msra.mxu2 %v2250_v44  ;;  %1355 = vmatpush.bf16.msra.mxu3 %v2378_v45 }
 0x11a   :  { %1317 = vmatpush.bf16.msra.mxu0 %v1978_v56  ;;  %1330 = vmatpush.bf16.msra.mxu1 %v2106_v57 }
 0x11b   :  { %1343 = vmatpush.bf16.msra.mxu2 %v2234_v60  ;;  %1356 = vmatpush.bf16.msra.mxu3 %v2362_v62 }
 0x11e   :  { %1318 = vmatpush.bf16.msra.mxu0 %v1962_v20  ;;  %1331 = vmatpush.bf16.msra.mxu1 %v2090_v54 }
 0x11f   :  { %1344 = vmatpush.bf16.msra.mxu2 %v2218_v16  ;;  %1357 = vmatpush.bf16.msra.mxu3 %v2346_v41 }
 0x122   :  { %1319 = vmatpush.bf16.msra.mxu0 %v1946_v13  ;;  %1332 = vmatpush.bf16.msra.mxu1 %v2074_v14 }
 0x123   :  { %1345 = vmatpush.bf16.msra.mxu2 %v2202_v19  ;;  %1358 = vmatpush.bf16.msra.mxu3 %v2330_v61 }
 0x126   :  { %1320 = vmatpush.bf16.msra.mxu0 %v1930_v27  ;;  %1333 = vmatpush.bf16.msra.mxu1 %v2058_v28 }
 0x127   :  { %1346 = vmatpush.bf16.msra.mxu2 %v2186_v1  ;;  %1359 = vmatpush.bf16.msra.mxu3 %v2314_v17 }
 0x129   :  { %1321 = vmatmul.bf16.vlgmr.msra.gmra.mxu0 %v3084_v47  ;;  %1334 = vmatmul.bf16.vlgmr.msra.gmra.mxu1 %v3086_v29 }
 0x12a   :  { %1347 = vmatmul.bf16.vlgmr.msra.gmra.mxu2 %v3088_v30  ;;  %1360 = vmatmul.bf16.vlgmr.msra.gmra.mxu3 %v3090_v31 }
 0x165   :  { %v1166_v32 = vpop.f32.mrf.mxu0  ;;  %v1179_v33 = vpop.f32.mrf.mxu1 }
 0x166   :  { %v1180_v34 = vadd.f32 %v1179_v33, %v1166_v32 }
 0x16c   :  { %v1192_v35 = vpop.f32.mrf.mxu2  ;;  %v1205_v26 = vpop.f32.mrf.mxu3 }
 0x16d   :  { %v1193_v36 = vadd.f32 %v1192_v35, %v1180_v34  ;;  %v1168_v37 = vpop.f32.mrf.mxu0  ;;  %v1181_v38 = vpop.f32.mrf.mxu1 }
 0x16f   :  { %v3108_v39 = vadd.f32 %v1205_v26, %v1193_v36 }
 0x171   :  { %v1369_v0 = vrot.slane %v3108_v39, 4  ;;  %v1397_v3 = vmul.f32 %v3108_v39, %v3108_v39 }
 0x173   :  { %v1370_v6 = vadd.f32 %v1369_v0, %v3108_v39  ;;  %v1401_v16 = vrot.slane %v1397_v3, 4 }
 0x174   :  { %v1194_v40 = vpop.f32.mrf.mxu2  ;;  %v1207_v42 = vpop.f32.mrf.mxu3 }
 0x175   :  { %v1218_v43 = vpop.f32.mrf.mxu0  ;;  %v1231_v47 = vpop.f32.mrf.mxu1  ;;  %v1371_v14 = vrot.slane %v1370_v6, 2  ;;  %v1402_v15 = vadd.f32 %v1401_v16, %v1397_v3  ;;  %v2698_v3 = vld [vmem:[#allocation8 + $0x38] sm:$0xff] }
 0x176   :  { %v1232_v48 = vadd.f32 %v1231_v47, %v1218_v43  ;;  %1807 = vmatpush.bf16.msrb.mxu0 %v2698_v3 }
 0x177   :  { %v1372_v25 = vadd.f32 %v1371_v14, %v1370_v6  ;;  %v1403_v24 = vrot.slane %v1402_v15, 2  ;;  %v2722_v6 = vld [vmem:[#allocation8 + $0xf8] sm:$0xff] }
 0x178   :  { %1846 = vmatpush.bf16.msrb.mxu3 %v2722_v6 }
 0x179   :  { %v1373_v17 = vrot.slane %v1372_v25, 1  ;;  %v1404_v32 = vadd.f32 %v1403_v24, %v1402_v15  ;;  %v2712_v24 = vld [vmem:[#allocation8 + $0xa8] sm:$0xff] }
 0x17b   :  { %v1374_v36 = vadd.f32 %v1373_v17, %v1372_v25  ;;  %v1405_v37 = vrot.slane %v1404_v32, 1  ;;  %v2704_v25 = vld [vmem:[#allocation8 + $0x68] sm:$0xff] }
 0x17c   :  { %v1244_v44 = vpop.f32.mrf.mxu2  ;;  %v1257_v29 = vpop.f32.mrf.mxu3 }
 0x17d   :  { %v1220_v45 = vpop.f32.mrf.mxu0  ;;  %v1233_v30 = vpop.f32.mrf.mxu1  ;;  %v1245_v31 = vadd.f32 %v1244_v44, %v1232_v48 }
 0x17e   :  { %v1406_v45 = vadd.f32 %v1405_v37, %v1404_v32  ;;  %v2695_v32 = vld [vmem:[#allocation8 + $0x20] sm:$0xff] }
 0x17f   :  { %v3110_v50 = vadd.f32 %v1257_v29, %v1245_v31  ;;  %v3132_v29 = vmul.f32 0.125, %v1374_v36 }
 0x181   :  { %v1375_v56 = vrot.slane %v3110_v50, 4  ;;  %v1398_v57 = vmul.f32 %v3110_v50, %v3110_v50 }
 0x183   :  { %v1376_v59 = vadd.f32 %v1375_v56, %v3110_v50  ;;  %v1407_v60 = vrot.slane %v1398_v57, 4 }
 0x184   :  { %v1246_v49 = vpop.f32.mrf.mxu2  ;;  %v1259_v46 = vpop.f32.mrf.mxu3 }
 0x185   :  { %v1377_v54 = vrot.slane %v1376_v59, 2  ;;  %v1408_v2 = vadd.f32 %v1407_v60, %v1398_v57  ;;  %v1425_v46 = vmul.f32 0.125, %v1406_v45  ;;  %v2694_v45 = vld [vmem:[#allocation8 + $0x18] sm:$0xff] }
 0x186   :  { %v1270_v51 = vpop.f32.mrf.mxu0  ;;  %v1283_v53 = vpop.f32.mrf.mxu1 }
 0x187   :  { %v1284_v58 = vadd.f32 %v1283_v53, %v1270_v51  ;;  %v1378_v10 = vadd.f32 %v1377_v54, %v1376_v59  ;;  %v1409_v11 = vrot.slane %v1408_v2, 2  ;;  %v1429_v51 = vmul.f32 %v3132_v29, %v3132_v29 }
 0x189   :  { %v1379_v21 = vrot.slane %v1378_v10, 1  ;;  %v1410_v23 = vadd.f32 %v1409_v11, %v1408_v2  ;;  %v1433_v0 = vsub.f32 %v1425_v46, %v1429_v51  ;;  %v2697_v11 = vld [vmem:[#allocation8 + $0x30] sm:$0xff] }
 0x18a   :  { %1808 = vmatpush.bf16.msrb.mxu0 %v2697_v11 }
 0x18b   :  { %v1380_v28 = vadd.f32 %v1379_v21, %v1378_v10  ;;  %v1411_v1 = vrot.slane %v1410_v23, 1 }
 0x18d   :  { %v3126_v35 = vmul.f32 0.125, %v1380_v28  ;;  %v1412_v26 = vadd.f32 %v1411_v1, %v1410_v23  ;;  %v2696_v23 = vld [vmem:[#allocation8 + $0x28] sm:$0xff] }
 0x18e   :  { %v1272_v4 = vpop.f32.mrf.mxu0  ;;  %v1285_v5 = vpop.f32.mrf.mxu1  ;;  %v2720_v28 = vld [vmem:[#allocation8 + $0xe8] sm:$0xff]  ;;  %1809 = vmatpush.bf16.msrb.mxu0 %v2696_v23 }
 0x18f   :  { %v1296_v62 = vpop.f32.mrf.mxu2  ;;  %v1309_v63 = vpop.f32.mrf.mxu3  ;;  %v1426_v47 = vmul.f32 0.125, %v1412_v26  ;;  %v1430_v44 = vmul.f32 %v3126_v35, %v3126_v35  ;;  %v2714_v4 = vld [vmem:[#allocation8 + $0xb8] sm:$0xff] }
 0x190   :  { %v1297_v8 = vadd.f32 %v1296_v62, %v1284_v58  ;;  %1833 = vmatpush.bf16.msrb.mxu2 %v2714_v4  ;;  %v2700_v4 = vld [vmem:[#allocation8 + $0x48] sm:$0xff] }
 0x191   :  { %v1434_v31 = vsub.f32 %v1426_v47, %v1430_v44 }
 0x192   :  { %v3119_v20 = vadd.f32 %v1309_v63, %v1297_v8  ;;  %v2706_v8 = vld [vmem:[#allocation8 + $0x78] sm:$0xff]  ;;  %1810 = vmatpush.bf16.msrb.mxu0 %v2695_v32 }
 0x193   :  { %v1438_v62 = vmax.f32 %v1434_v31, 0.0  ;;  %1820 = vmatpush.bf16.msrb.mxu1 %v2706_v8  ;;  %v2692_v8 = vld [vmem:[#allocation8 + $0x8] sm:$0xff] }
 0x194   :  { %v1381_v41 = vrot.slane %v3119_v20, 4  ;;  %v1399_v7 = vmul.f32 %v3119_v20, %v3119_v20 }
 0x195   :  { %v3143_v16 = vadd.f32 1e-05, %v1438_v62 }
 0x196   :  { %v1382_v9 = vadd.f32 %v1381_v41, %v3119_v20  ;;  %v1413_v52 = vrot.slane %v1399_v7, 4  ;;  %1811 = vmatpush.bf16.msrb.mxu0 %v2694_v45 }
 0x197   :  { %v1298_v12 = vpop.f32.mrf.mxu2  ;;  %v1311_v13 = vpop.f32.mrf.mxu3  ;;  %2742 = vrsqrt.f32 %v3143_v16  ;;  %vm1461_vm1 = vweird.f32 %v3143_v16 }
 0x198   :  { %v1383_v18 = vrot.slane %v1382_v9, 2  ;;  %v1414_v19 = vadd.f32 %v1413_v52, %v1399_v7  ;;  %v2705_v12 = vld [vmem:[#allocation8 + $0x70] sm:$0xff] }
 0x199   :  { %v2713_v13 = vld [vmem:[#allocation8 + $0xb0] sm:$0xff]  ;;  %1821 = vmatpush.bf16.msrb.mxu1 %v2705_v12 }
 0x19a   :  { %v1384_v61 = vadd.f32 %v1383_v18, %v1382_v9  ;;  %v1415_v22 = vrot.slane %v1414_v19, 2  ;;  %v1437_v9 = vmax.f32 %v1433_v0, 0.0  ;;  %1834 = vmatpush.bf16.msrb.mxu2 %v2713_v13  ;;  %v2717_v0 = vld [vmem:[#allocation8 + $0xd0] sm:$0xff] }
 0x19c   :  { %v1385_v55 = vrot.slane %v1384_v61, 1  ;;  %v1416_v27 = vadd.f32 %v1415_v22, %v1414_v19  ;;  %v2721_v19 = vld [vmem:[#allocation8 + $0xf0] sm:$0xff]  ;;  %v3149_v21 = vadd.f32 1e-05, %v1437_v9  ;;  %v2699_v9 = vld [vmem:[#allocation8 + $0x40] sm:$0xff] }
 0x19d   :  { %1847 = vmatpush.bf16.msrb.mxu3 %v2721_v19  ;;  %1822 = vmatpush.bf16.msrb.mxu1 %v2704_v25  ;;  %v3153_v26 = vpop.eup %2742 }
 0x19e   :  { %v1386_v33 = vadd.f32 %v1385_v55, %v1384_v61  ;;  %v1417_v34 = vrot.slane %v1416_v27, 1  ;;  %1835 = vmatpush.bf16.msrb.mxu2 %v2712_v24  ;;  %v1456_v44 = vmul.f32 %v3153_v26, %v3143_v16  ;;  %vm1462_vm0 = vweird.f32 %v3153_v26 }
 0x19f   :  { %vm1463_vm3 = vmor %vm1461_vm1, %vm1462_vm0  ;;  %vm1451_vm11 = vweird.f32 %v3149_v21 }
 0x1a0   :  { %v3128_v38 = vmul.f32 0.125, %v1386_v33  ;;  %v1418_v40 = vadd.f32 %v1417_v34, %v1416_v27  ;;  %v2703_v33 = vld [vmem:[#allocation8 + $0x60] sm:$0xff] }
 0x1a1   :  { %1848 = vmatpush.bf16.msrb.mxu3 %v2720_v28  ;;  %v2711_v34 = vld [vmem:[#allocation8 + $0xa0] sm:$0xff]  ;;  %1823 = vmatpush.bf16.msrb.mxu1 %v2703_v33 }
 0x1a2   :  { %v1427_v30 = vmul.f32 0.125, %v1418_v40  ;;  %v1431_v48 = vmul.f32 %v3128_v38, %v3128_v38  ;;  %v2719_v40 = vld [vmem:[#allocation8 + $0xe0] sm:$0xff]  ;;  %1836 = vmatpush.bf16.msrb.mxu2 %v2711_v34 }
 0x1a4   :  { %v1435_v57 = vsub.f32 %v1427_v30, %v1431_v48  ;;  %v2702_v30 = vld [vmem:[#allocation8 + $0x58] sm:$0xff] }
 0x1a5   :  { %1849 = vmatpush.bf16.msrb.mxu3 %v2719_v40  ;;  %v2710_v48 = vld [vmem:[#allocation8 + $0x98] sm:$0xff]  ;;  %1824 = vmatpush.bf16.msrb.mxu1 %v2702_v30 }
 0x1a6   :  { %v1322_v42 = vpop.f32.mrf.mxu0  ;;  %v1335_v43 = vpop.f32.mrf.mxu1  ;;  %v1439_v5 = vmax.f32 %v1435_v57, 0.0  ;;  %1837 = vmatpush.bf16.msrb.mxu2 %v2710_v48  ;;  %v2693_v57 = vld [vmem:[#allocation8 + $0x10] sm:$0xff] }
 0x1a7   :  { %v1336_v49 = vadd.f32 %v1335_v43, %v1322_v42  ;;  %1812 = vmatpush.bf16.msrb.mxu0 %v2693_v57 }
 0x1a8   :  { %v3146_v14 = vadd.f32 1e-05, %v1439_v5  ;;  %v2708_v5 = vld [vmem:[#allocation8 + $0x88] sm:$0xff] }
 0x1aa   :  { %2744 = vrsqrt.f32 %v3146_v14  ;;  %vm1471_vm4 = vweird.f32 %v3146_v14 }
 0x1ab   :  { %2746 = vrsqrt.f32 %v3149_v21  ;;  %1813 = vmatpush.bf16.msrb.mxu0 %v2692_v8 }
 0x1ad   :  { %v1348_v53 = vpop.f32.mrf.mxu2  ;;  %v1361_v56 = vpop.f32.mrf.mxu3 }
 0x1ae   :  { %v1349_v58 = vadd.f32 %v1348_v53, %v1336_v49  ;;  %v1324_v59 = vpop.f32.mrf.mxu0  ;;  %v1337_v60 = vpop.f32.mrf.mxu1  ;;  %v2718_v49 = vld [vmem:[#allocation8 + $0xd8] sm:$0xff] }
 0x1af   :  { %1850 = vmatpush.bf16.msrb.mxu3 %v2718_v49  ;;  %v2709_v59 = vld [vmem:[#allocation8 + $0x90] sm:$0xff] }
 0x1b0   :  { %v3138_v63 = vadd.f32 %v1361_v56, %v1349_v58  ;;  %v3157_v42 = vpop.eup %2744  ;;  %v1457_v56 = vmul.f32 %v3153_v26, %v1456_v44  ;;  %v2701_v58 = vld [vmem:[#allocation8 + $0x50] sm:$0xff]  ;;  %1838 = vmatpush.bf16.msrb.mxu2 %v2709_v59 }
 0x1b1   :  { %v3163_v46 = vpop.eup %2746  ;;  %v1466_v51 = vmul.f32 %v3157_v42, %v3146_v14  ;;  %1825 = vmatpush.bf16.msrb.mxu1 %v2701_v58  ;;  %vm1472_vm2 = vweird.f32 %v3157_v42  ;;  %v1366_v14 = vld [vmem:[#allocation10 + $0x2] ss:$4 sm:$0xf] }
 0x1b2   :  { %v1387_v54 = vrot.slane %v3138_v63, 4  ;;  %v1400_v2 = vmul.f32 %v3138_v63, %v3138_v63  ;;  %v1446_v60 = vmul.f32 %v3163_v46, %v3149_v21  ;;  %vm1452_vm7 = vweird.f32 %v3163_v46  ;;  %vm1473_vm8 = vmor %vm1471_vm4, %vm1472_vm2 }
 0x1b3   :  { %v1467_v3 = vmul.f32 %v3157_v42, %v1466_v51  ;;  %1851 = vmatpush.bf16.msrb.mxu3 %v2717_v0  ;;  %vm1453_vm12 = vmor %vm1451_vm11, %vm1452_vm7 }
 0x1b4   :  { %v1388_v41 = vadd.f32 %v1387_v54, %v3138_v63  ;;  %v1419_v7 = vrot.slane %v1400_v2, 4  ;;  %v2716_v54 = vld [vmem:[#allocation8 + $0xc8] sm:$0xff]  ;;  %v1447_v6 = vmul.f32 %v3163_v46, %v1446_v60  ;;  %1839 = vmatpush.bf16.msrb.mxu2 %v2708_v5 }
 0x1b5   :  { %v1350_v52 = vpop.f32.mrf.mxu2  ;;  %v1363_v10 = vpop.f32.mrf.mxu3  ;;  %1826 = vmatpush.bf16.msrb.mxu1 %v2700_v4 }
 0x1b6   :  { %v1389_v15 = vrot.slane %v1388_v41, 2  ;;  %v1420_v18 = vadd.f32 %v1419_v7, %v1400_v2  ;;  %v1458_v2 = vmul.f32 0.5, %v1457_v56  ;;  %v2691_v7 = vld [vmem:[#allocation8] sm:$0xff]  ;;  %v1448_v13 = vmul.f32 0.5, %v1447_v6 }
 0x1b7   :  { %1852 = vmatpush.bf16.msrb.mxu3 %v2716_v54  ;;  %v2707_v52 = vld [vmem:[#allocation8 + $0x80] sm:$0xff]  ;;  %1814 = vmatpush.bf16.msrb.mxu0 %v2691_v7 }
 0x1b8   :  { %v1390_v61 = vadd.f32 %v1389_v15, %v1388_v41  ;;  %v1421_v22 = vrot.slane %v1420_v18, 2  ;;  %v1468_v41 = vmul.f32 0.5, %v1467_v3  ;;  %v2715_v10 = vld [vmem:[#allocation8 + $0xc0] sm:$0xff]  ;;  %v1459_v11 = vsub.f32 1.5, %v1458_v2  ;;  %1840 = vmatpush.bf16.msrb.mxu2 %v2707_v52 }
 0x1b9   :  { %1827 = vmatpush.bf16.msrb.mxu1 %v2699_v9  ;;  %v1368_v56 = vld [vmem:[#allocation10 + $0x3] ss:$4 sm:$0xf] }
 0x1ba   :  { %v1391_v55 = vrot.slane %v1390_v61, 1  ;;  %v1422_v27 = vadd.f32 %v1421_v22, %v1420_v18  ;;  %v1469_v15 = vsub.f32 1.5, %v1468_v41  ;;  %v1460_v19 = vmul.f32 %v3153_v26, %v1459_v11 }
 0x1bb   :  { %1853 = vmatpush.bf16.msrb.mxu3 %v2715_v10  ;;  %v1449_v22 = vsub.f32 1.5, %v1448_v13 }
 0x1bc   :  { %v1392_v1 = vadd.f32 %v1391_v55, %v1390_v61  ;;  %v1423_v17 = vrot.slane %v1422_v27, 1  ;;  %v1470_v23 = vmul.f32 %v3157_v42, %v1469_v15  ;;  %v1464_v24 = vsel %vm1463_vm3, %v3153_v26, %v1460_v19 }
 0x1be   :  { %v3155_v36 = vmul.f32 0.125, %v1392_v1  ;;  %v1424_v37 = vadd.f32 %v1423_v17, %v1422_v27  ;;  %v1450_v27 = vmul.f32 %v3163_v46, %v1449_v22  ;;  %v1474_v28 = vsel %vm1473_vm8, %v3157_v42, %v1470_v23 }
 0x1bf   :  { %v1489_v1 = vrot.slane %v1464_v24, 7  ;;  %v1490_v32 = vrot.slane %v1474_v28, 6 }
 0x1c0   :  { %v1428_v43 = vmul.f32 0.125, %v1424_v37  ;;  %v1432_v47 = vmul.f32 %v3155_v36, %v3155_v36  ;;  %v1454_v34 = vsel %vm1453_vm12, %v3163_v46, %v1450_v27 }
 0x1c1   :  { %v1492_v26 = vsel %vm331_vm6, %v1454_v34, %v1489_v1 }
 0x1c2   :  { %v1436_v31 = vsub.f32 %v1428_v43, %v1432_v47 }
 0x1c4   :  { %v1440_v53 = vmax.f32 %v1436_v31, 0.0 }
 0x1c6   :  { %v1444_v62 = vadd.f32 1e-05, %v1440_v53 }
 0x1c8   :  { %2748 = vrsqrt.f32 %v1444_v62  ;;  %vm1481_vm9 = vweird.f32 %v1444_v62 }
 0x1ce   :  { %v2749_v12 = vpop.eup %2748 }
 0x1cf   :  { %v1476_v18 = vmul.f32 %v2749_v12, %v1444_v62  ;;  %vm1482_vm5 = vweird.f32 %v2749_v12 }
 0x1d0   :  { %vm1483_vm10 = vmor %vm1481_vm9, %vm1482_vm5 }
 0x1d1   :  { %v1477_v61 = vmul.f32 %v2749_v12, %v1476_v18 }
 0x1d3   :  { %v1478_v25 = vmul.f32 0.5, %v1477_v61 }
 0x1d5   :  { %v1479_v55 = vsub.f32 1.5, %v1478_v25 }
 0x1d7   :  { %v1480_v16 = vmul.f32 %v2749_v12, %v1479_v55 }
 0x1d9   :  { %v1484_v17 = vsel %vm1483_vm10, %v2749_v12, %v1480_v16 }
 0x1da   :  { %v1491_v33 = vrot.slane %v1484_v17, 5 }
 0x1dc   :  { %v1493_v37 = vsel %vm333_vm13, %v1490_v32, %v1491_v33 }
 0x1dd   :  { %v1494_v40 = vsel %vm335_vm15, %v1492_v26, %v1493_v37 }
 0x1de   :  { %v1496_v42 = vmul.f32 %v1494_v40, %v1366_v14 }
 0x1e0   :  { %v1500_v43 = vperm.slane %v1496_v42, 2  ;;  %v1501_v47 = vperm.slane %v1496_v42, 3  ;;  %v1499_v44 = vperm.slane %v1496_v42, 1  ;;  %v1498_v45 = vperm.slane %v1496_v42, 0 }
 0x1e2   :  { %v1508_v21 = vmul.f32 %v1500_v43, %v3128_v38  ;;  %v1509_v30 = vmul.f32 %v1501_v47, %v3155_v36  ;;  %v1507_v48 = vmul.f32 %v1499_v44, %v3126_v35  ;;  %v1506_v46 = vmul.f32 %v1498_v45, %v3132_v29 }
 0x1e3   :  { %v1525_v60 = vmul.f32 %v1501_v47, %v3138_v63  ;;  %v1522_v38 = vmul.f32 %v1498_v45, %v3108_v39  ;;  %v1523_v36 = vmul.f32 %v1499_v44, %v3110_v50  ;;  %v1524_v35 = vmul.f32 %v1500_v43, %v3119_v20  ;;  %v2733_v50 = vld [vmem:[%s3209_s5] ss:$0 sm:$0xff] }
 0x1e4   :  { %v1515_v31 = vrot.slane %v1508_v21, 6  ;;  %v1516_v49 = vrot.slane %v1509_v30, 5  ;;  %v1514_v51 = vrot.slane %v1507_v48, 7 }
 0x1e6   :  { %v1518_v53 = vsel %vm333_vm13, %v1515_v31, %v1516_v49  ;;  %v1517_v57 = vsel %vm331_vm6, %v1506_v46, %v1514_v51 }
 0x1e7   :  { %v1519_v58 = vsel %vm335_vm15, %v1517_v57, %v1518_v53 }
 0x1e8   :  { %v1521_v59 = vsub.f32 %v1368_v56, %v1519_v58 }
 0x1ea   :  { %v1527_v62 = vperm.slane %v1521_v59, 0  ;;  %v1528_v0 = vperm.slane %v1521_v59, 1  ;;  %v1529_v29 = vperm.slane %v1521_v59, 2  ;;  %v1530_v3 = vperm.slane %v1521_v59, 3 }
 0x1ec   :  { %v1535_v8 = vadd.f32 %v1527_v62, %v1522_v38  ;;  %v1536_v4 = vadd.f32 %v1528_v0, %v1523_v36  ;;  %v1537_v5 = vadd.f32 %v1529_v29, %v1524_v35  ;;  %v1538_v54 = vadd.f32 %v1530_v3, %v1525_v60 }
 0x1ee   :  { %v1539_v2 = vmax.f32 %v1535_v8, 0.0  ;;  %v1540_v6 = vmax.f32 %v1536_v4, 0.0  ;;  %v1541_v41 = vmax.f32 %v1537_v5, 0.0  ;;  %v1542_v7 = vmax.f32 %v1538_v54, 0.0 }
 0x1f0   :  { %v1543_v9 = vpack.c.bf16 %v1539_v2, %v1539_v2  ;;  %v1544_v63 = vpack.c.bf16 %v1540_v6, %v1540_v6  ;;  %v1545_v52 = vpack.c.bf16 %v1541_v41, %v1541_v41  ;;  %v1546_v39 = vpack.c.bf16 %v1542_v7, %v1542_v7 }
 0x1f2   :  { %1815 = vmatmul.bf16.vlgmr.msrb.gmra.mxu0 %v1543_v9  ;;  %1828 = vmatmul.bf16.vlgmr.msrb.gmra.mxu1 %v1544_v63 }
 0x1f3   :  { %1841 = vmatmul.bf16.vlgmr.msrb.gmra.mxu2 %v1545_v52  ;;  %1854 = vmatmul.bf16.vlgmr.msrb.gmra.mxu3 %v1546_v39 }
 0x26f   :  { %v1816_v20 = vpop.f32.mrf.mxu0  ;;  %v1829_v10 = vpop.f32.mrf.mxu1 }
 0x270   :  { %v1817_v11 = vadd.f32 %v2733_v50, %v1816_v20 }
 0x272   :  { %v1830_v12 = vadd.f32 %v1829_v10, %v1817_v11 }
 0x276   :  { %v1842_v13 = vpop.f32.mrf.mxu2  ;;  %v1855_v15 = vpop.f32.mrf.mxu3 }
 0x277   :  { %v1843_v18 = vadd.f32 %v1842_v13, %v1830_v12  ;;  %v1818_v19 = vpop.f32.mrf.mxu0  ;;  %v1831_v61 = vpop.f32.mrf.mxu1 }
 0x279   :  { %v1856_v22 = vadd.f32 %v1855_v15, %v1843_v18 }
 0x27b   :  { %1859 = vst [vmem:[#allocation11] sm:$0xff] %v1856_v22 }
 0x27c   :  { %1870 = dma.vmem_to_hbm [thread:$0]  %s1866_s24, 128, %s1868_s27, [#allocation4]  }
 0x27e   :  { %v1844_v23 = vpop.f32.mrf.mxu2  ;;  %v1857_v25 = vpop.f32.mrf.mxu3 }
 0x27f   :  { %2900 = dma.done.wait [#allocation4], 128  }
 0x280   :  { %2901 = vsyncadd [#allocation4], 4294967168 }
 0x281   :  { %1875 = vsyncpa [#allocation3], 1 }
 0x282   :  { %1876 = vsyncpa [#allocation6], 1 }
 0x283   :  { %1877 = vsyncpa [#allocation9], 1 }
 0x284   :  { %1878 = vsyncpa [#allocation4], 1 }

</bundles_post_ra>
